<compile_context>
chip_gen: v6e
topology: v6e:2x2x1
jax: 0.10.0
libtpu: 0.0.40
codegen_flags: <defaults>
</compile_context>

<pallas_src>
import functools

import jax
import jax.numpy as jnp
import numpy as np
from jax.experimental import pallas as pl
from jax.experimental.pallas import tpu as pltpu

# ----------------------------- configuration --------------------------------
N_TOKEN = 512
D_EMBED = 64
D_PROJ = 128
CUTOFFS = [256, 384]          # + [n_token] appended internally
INIT_STD = 0.02
PROJ_INIT_STD = 0.01
TEMPERATURE = 1.0

C0 = CUTOFFS[0]               # shortlist size
C1 = CUTOFFS[1]
N_CLUSTERS = 2
HEAD_SIZE = C0 + N_CLUSTERS   # 258 (logical head width)
HEAD_PAD = 384                # padded to a lane multiple (3 * 128)
V1 = C1 - C0                  # 128
V2 = N_TOKEN - C1             # 128
N_ALL = HEAD_PAD + V1 + V2    # 640 = fused logit width
K_CAT = 3 * D_EMBED           # 192 = fused projected-hidden width

N_TOK_BATCH = 64              # len*bsz (number of tokens)
NEG_BIG = -1e30               # bias for padded head columns (never wins the softmax)


# ------------------------------- kernel -------------------------------------
def _adaptive_nll_kernel(hid_ref, tgt_ref, pcat_ref, wcat_ref, bcat_ref, nll_ref):
    h = hid_ref[...]                     # (BN, D_PROJ) f32
    tgt = tgt_ref[...]                   # (BN, 1) int32

    # Fused stage 1: h @ [P0 | P1 | P2]            -> (BN, 192)
    ph = jnp.dot(h, pcat_ref[...], preferred_element_type=jnp.float32)
    # Fused stage 2: block-diagonal vocab weights  -> (BN, 640)
    logits = jnp.dot(ph, wcat_ref[...], preferred_element_type=jnp.float32) + bcat_ref[...]
    if TEMPERATURE != 1.0:               # trace-time constant: skipped when == 1.0
        logits = logits * (1.0 / TEMPERATURE)

    def log_softmax(x):
        m = jnp.max(x, axis=-1, keepdims=True)
        return x - (m + jnp.log(jnp.sum(jnp.exp(x - m), axis=-1, keepdims=True)))

    head_lp = log_softmax(logits[:, 0:HEAD_PAD])                       # (BN, 384)
    t1_lp = log_softmax(logits[:, HEAD_PAD:HEAD_PAD + V1])             # (BN, 128)
    t2_lp = log_softmax(logits[:, HEAD_PAD + V1:HEAD_PAD + V1 + V2])   # (BN, 128)

    def gather_cols(lp, idx):
        # one-hot gather: lp[n, idx[n]] (out-of-range idx -> 0, masked away later)
        cols = jax.lax.broadcasted_iota(jnp.int32, lp.shape, 1)
        return jnp.sum(jnp.where(cols == idx, lp, 0.0), axis=-1, keepdims=True)  # (BN,1)

    head_at_tgt = gather_cols(head_lp, tgt)                        # shortlist tokens
    head_m1 = head_lp[:, HEAD_SIZE - 1:HEAD_SIZE]                  # head_logprob[:, -1] (col 257)
    head_m2 = head_lp[:, HEAD_SIZE - 2:HEAD_SIZE - 1]              # head_logprob[:, -2] (col 256)
    t1_at = gather_cols(t1_lp, tgt - C0)
    t2_at = gather_cols(t2_lp, tgt - C1)

    in0 = tgt < C0
    in1 = jnp.logical_and(tgt >= C0, tgt < C1)
    logprob = jnp.where(in0, head_at_tgt,
                        jnp.where(in1, head_m1 + t1_at, head_m2 + t2_at))   # (BN,1)
    nll_ref[...] = jnp.broadcast_to(-logprob, nll_ref.shape)


# ------------------------------- wrapper -------------------------------------
def _num_tensorcores():
    try:
        kind = jax.devices()[0].device_kind.lower()
    except Exception:
        return 1
    return 2 if ("v7" in kind or "7x" in kind) else 1


def _pick_block_rows(n, n_cores):
    # Largest multiple-of-8 row tile such that the grid splits evenly over the TCs.
    for bn in (512, 256, 128, 64, 32, 16, 8):
        if bn <= n and n % bn == 0 and (n // bn) % n_cores == 0:
            return bn
    return n


@functools.partial(jax.jit, static_argnames=("bn",))
def adaptive_logsoftmax_nll(hidden, target, params, *, bn):
    """hidden: [N, d_proj] f32, target: [N] int32  ->  nll: [N] f32 (keep_order=True)."""
    n = hidden.shape[0]
    assert n % bn == 0 and bn % 8 == 0

    W = params["out_w"]          # (n_token, d_embed)
    b = params["out_b"]          # (n_token,)

    # --- fused projection [P0 | P1 | P2] : (d_proj, 3*d_embed) ---
    pcat = jnp.concatenate([params["proj0"], params["proj1"], params["proj2"]], axis=1)

    # --- fused block-diagonal vocab weight : (3*d_embed, HEAD_PAD + V1 + V2) ---
    head_wT = jnp.concatenate([W[:C0], params["cluster_w"]], axis=0).T          # (64, 258)
    head_wT = jnp.pad(head_wT, ((0, 0), (0, HEAD_PAD - HEAD_SIZE)))             # (64, 384)
    w1T = W[C0:C1].T                                                            # (64, 128)
    w2T = W[C1:].T                                                              # (64, 128)
    wcat = jnp.zeros((K_CAT, N_ALL), jnp.float32)
    wcat = wcat.at[0:D_EMBED, 0:HEAD_PAD].set(head_wT)
    wcat = wcat.at[D_EMBED:2 * D_EMBED, HEAD_PAD:HEAD_PAD + V1].set(w1T)
    wcat = wcat.at[2 * D_EMBED:3 * D_EMBED, HEAD_PAD + V1:].set(w2T)

    # --- fused bias; padded head columns get -1e30 so they never win the softmax ---
    head_b = jnp.concatenate([b[:C0], params["cluster_b"]], axis=0)             # (258,)
    head_b = jnp.concatenate(
        [head_b, jnp.full((HEAD_PAD - HEAD_SIZE,), NEG_BIG, jnp.float32)], axis=0)
    bcat = jnp.concatenate([head_b, b[C0:C1], b[C1:]], axis=0)[None, :]         # (1, 640)

    tgt2d = target.astype(jnp.int32)[:, None]                                   # (N, 1)

    def full(shape):
        return pl.BlockSpec(shape, lambda i, _s=shape: tuple(0 for _ in _s))

    nll2d = pl.pallas_call(
        _adaptive_nll_kernel,
        out_shape=jax.ShapeDtypeStruct((n, 128), jnp.float32),
        grid=(pl.cdiv(n, bn),),
        in_specs=[
            pl.BlockSpec((bn, D_PROJ), lambda i: (i, 0)),   # hidden
            pl.BlockSpec((bn, 1), lambda i: (i, 0)),        # target (one scalar per row)
            full((D_PROJ, K_CAT)),                          # [P0|P1|P2]
            full((K_CAT, N_ALL)),                           # block-diag vocab weights
            full((1, N_ALL)),                               # fused bias
        ],
        out_specs=pl.BlockSpec((bn, 128), lambda i: (i, 0)),
        compiler_params=pltpu.CompilerParams(dimension_semantics=("parallel",)),
    )(hidden, tgt2d, pcat, wcat, bcat)
    return nll2d[:, 0]


# -------------------------- pure-JAX reference -------------------------------
def reference_nll(hidden, target, params):
    def compute_logit(h, w, bias, proj):
        return (h @ proj) @ w.T + bias

    W, b = params["out_w"], params["out_b"]
    head_w = jnp.concatenate([W[:C0], params["cluster_w"]], axis=0)
    head_b = jnp.concatenate([b[:C0], params["cluster_b"]], axis=0)

    head_lp = jax.nn.log_softmax(
        compute_logit(hidden, head_w, head_b, params["proj0"]) / TEMPERATURE, axis=1)
    lp0 = jnp.take_along_axis(head_lp, jnp.clip(target, 0, HEAD_SIZE - 1)[:, None], axis=1)[:, 0]

    lp1_full = jax.nn.log_softmax(
        compute_logit(hidden, W[C0:C1], b[C0:C1], params["proj1"]) / TEMPERATURE, axis=1)
    t1 = jnp.clip(target - C0, 0, V1 - 1)
    lp1 = head_lp[:, -1] + jnp.take_along_axis(lp1_full, t1[:, None], axis=1)[:, 0]

    lp2_full = jax.nn.log_softmax(
        compute_logit(hidden, W[C1:], b[C1:], params["proj2"]) / TEMPERATURE, axis=1)
    t2 = jnp.clip(target - C1, 0, V2 - 1)
    lp2 = head_lp[:, -2] + jnp.take_along_axis(lp2_full, t2[:, None], axis=1)[:, 0]

    lp = jnp.where(target < C0, lp0, jnp.where(target < C1, lp1, lp2))
    return -lp


# ------------------------------ param init -----------------------------------
def init_params(key):
    k_w, k_cw, k_p0, k_p1, k_p2 = jax.random.split(key, 5)
    return {
        "out_w": INIT_STD * jax.random.normal(k_w, (N_TOKEN, D_EMBED), jnp.float32),
        "out_b": jnp.zeros((N_TOKEN,), jnp.float32),
        "cluster_w": INIT_STD * jax.random.normal(k_cw, (N_CLUSTERS, D_EMBED), jnp.float32),
        "cluster_b": jnp.zeros((N_CLUSTERS,), jnp.float32),
        "proj0": PROJ_INIT_STD * jax.random.normal(k_p0, (D_PROJ, D_EMBED), jnp.float32),
        "proj1": PROJ_INIT_STD * jax.random.normal(k_p1, (D_PROJ, D_EMBED), jnp.float32),
        "proj2": PROJ_INIT_STD * jax.random.normal(k_p2, (D_PROJ, D_EMBED), jnp.float32),
    }


if __name__ == "__main__":
    key = jax.random.PRNGKey(0)
    k_params, k_hid, k_tgt = jax.random.split(key, 3)

    params = init_params(k_params)
    hidden = jax.random.normal(k_hid, (N_TOK_BATCH, D_PROJ), jnp.float32)   # [len*bsz, d_proj]
    target = jax.random.randint(k_tgt, (N_TOK_BATCH,), 0, N_TOKEN, jnp.int32)

    # grid = 1 on single-TensorCore chips (v5e/v6e); grid = 2 (one tile per TC) on v7x.
    BN = _pick_block_rows(N_TOK_BATCH, _num_tensorcores())

    # TODO(synk): mos=True branch (mixture-of-softmaxes with LockedDropout), the
    # keep_order=False packed ordering, and the output=True return path are not implemented.
    # TODO(synk): for realistic vocab/batch sizes, cluster-sorted dispatch via scalar
    # prefetch would avoid computing the unused tail softmaxes per token.
    nll = adaptive_logsoftmax_nll(hidden, target, params, bn=BN)
    nll = jax.block_until_ready(nll)

    ref = reference_nll(hidden, target, params)
    np.testing.assert_allclose(np.asarray(nll), np.asarray(ref), rtol=1e-5, atol=1e-5)

    print("KERNEL_OK")
</pallas_src>

<mosaic_0001>
module attributes {stable_mosaic.version = 11 : i64} {
  func.func @_adaptive_nll_kernel(%arg0: i32, %arg1: memref<64x128xf32, #tpu.memory_space<vmem>>, %arg2: memref<64x1xi32, #tpu.memory_space<vmem>>, %arg3: memref<128x192xf32, #tpu.memory_space<vmem>>, %arg4: memref<192x640xf32, #tpu.memory_space<vmem>>, %arg5: memref<1x640xf32, #tpu.memory_space<vmem>>, %arg6: memref<64x128xf32, #tpu.memory_space<vmem>>) attributes {dimension_semantics = [#tpu.dimension_semantics<parallel>], iteration_bounds = array<i64: 1>, scalar_prefetch = 0 : i64, scratch_operands = 0 : i64, tpu.core_type = #tpu.core_type<tc>, window_params = [{transform_indices = @transform_0, window_bounds = array<i64: 64, 128>}, {transform_indices = @transform_1, window_bounds = array<i64: 64, 1>}, {pipeline_mode = #tpu.pipeline_mode<synchronous>, transform_indices = @transform_2, window_bounds = array<i64: 128, 192>}, {pipeline_mode = #tpu.pipeline_mode<synchronous>, transform_indices = @transform_3, window_bounds = array<i64: 192, 640>}, {pipeline_mode = #tpu.pipeline_mode<synchronous>, transform_indices = @transform_4, window_bounds = array<i64: 1, 640>}, {transform_indices = @transform_5, window_bounds = array<i64: 64, 128>}]} {
    %c0 = arith.constant 0 : index
    %c0_0 = arith.constant 0 : index
    %0 = vector.load %arg1[%c0, %c0_0] : memref<64x128xf32, #tpu.memory_space<vmem>>, vector<64x128xf32>
    %c0_1 = arith.constant 0 : index
    %c0_2 = arith.constant 0 : index
    %1 = vector.load %arg2[%c0_1, %c0_2] : memref<64x1xi32, #tpu.memory_space<vmem>>, vector<64x1xi32>
    %c0_3 = arith.constant 0 : index
    %c0_4 = arith.constant 0 : index
    %2 = vector.load %arg3[%c0_3, %c0_4] : memref<128x192xf32, #tpu.memory_space<vmem>>, vector<128x192xf32>
    %cst = arith.constant dense<0.000000e+00> : vector<64x192xf32>
    %3 = tpu.matmul %0, %2, %cst {dimension_numbers = #tpu.dot_dimension_numbers<[1], [0], [0], [1], [0, 0, 1, 1], [], []>} : vector<64x128xf32>, vector<128x192xf32>, vector<64x192xf32> -> vector<64x192xf32>
    %c0_5 = arith.constant 0 : index
    %c0_6 = arith.constant 0 : index
    %4 = vector.load %arg4[%c0_5, %c0_6] : memref<192x640xf32, #tpu.memory_space<vmem>>, vector<192x640xf32>
    %cst_7 = arith.constant dense<0.000000e+00> : vector<64x640xf32>
    %5 = tpu.matmul %3, %4, %cst_7 {dimension_numbers = #tpu.dot_dimension_numbers<[1], [0], [0], [1], [0, 0, 1, 1], [], []>} : vector<64x192xf32>, vector<192x640xf32>, vector<64x640xf32> -> vector<64x640xf32>
    %c0_8 = arith.constant 0 : index
    %c0_9 = arith.constant 0 : index
    %6 = vector.load %arg5[%c0_8, %c0_9] : memref<1x640xf32, #tpu.memory_space<vmem>>, vector<1x640xf32>
    %7 = vector.broadcast %6 : vector<1x640xf32> to vector<64x640xf32>
    %8 = arith.addf %5, %7 : vector<64x640xf32>
    %9 = vector.extract_strided_slice %8 {offsets = [0, 0], sizes = [64, 384], strides = [1, 1]} : vector<64x640xf32> to vector<64x384xf32>
    %cst_10 = arith.constant dense<0xFF800000> : vector<64xf32>
    %10 = vector.multi_reduction <maximumf>, %9, %cst_10 [1] : vector<64x384xf32> to vector<64xf32>
    %11 = vector.shape_cast %10 : vector<64xf32> to vector<64x1xf32>
    %12 = vector.broadcast %11 : vector<64x1xf32> to vector<64x384xf32>
    %13 = arith.subf %9, %12 : vector<64x384xf32>
    %14 = math.exp %13 : vector<64x384xf32>
    %cst_11 = arith.constant dense<0.000000e+00> : vector<64xf32>
    %15 = vector.multi_reduction <add>, %14, %cst_11 [1] : vector<64x384xf32> to vector<64xf32>
    %16 = vector.shape_cast %15 : vector<64xf32> to vector<64x1xf32>
    %17 = math.log %16 : vector<64x1xf32>
    %18 = arith.addf %11, %17 : vector<64x1xf32>
    %19 = vector.broadcast %18 : vector<64x1xf32> to vector<64x384xf32>
    %20 = arith.subf %9, %19 : vector<64x384xf32>
    %21 = vector.extract_strided_slice %8 {offsets = [0, 384], sizes = [64, 128], strides = [1, 1]} : vector<64x640xf32> to vector<64x128xf32>
    %cst_12 = arith.constant dense<0xFF800000> : vector<64xf32>
    %22 = vector.multi_reduction <maximumf>, %21, %cst_12 [1] : vector<64x128xf32> to vector<64xf32>
    %23 = vector.shape_cast %22 : vector<64xf32> to vector<64x1xf32>
    %24 = vector.broadcast %23 : vector<64x1xf32> to vector<64x128xf32>
    %25 = arith.subf %21, %24 : vector<64x128xf32>
    %26 = math.exp %25 : vector<64x128xf32>
    %cst_13 = arith.constant dense<0.000000e+00> : vector<64xf32>
    %27 = vector.multi_reduction <add>, %26, %cst_13 [1] : vector<64x128xf32> to vector<64xf32>
    %28 = vector.shape_cast %27 : vector<64xf32> to vector<64x1xf32>
    %29 = math.log %28 : vector<64x1xf32>
    %30 = arith.addf %23, %29 : vector<64x1xf32>
    %31 = vector.broadcast %30 : vector<64x1xf32> to vector<64x128xf32>
    %32 = arith.subf %21, %31 : vector<64x128xf32>
    %33 = vector.extract_strided_slice %8 {offsets = [0, 512], sizes = [64, 128], strides = [1, 1]} : vector<64x640xf32> to vector<64x128xf32>
    %cst_14 = arith.constant dense<0xFF800000> : vector<64xf32>
    %34 = vector.multi_reduction <maximumf>, %33, %cst_14 [1] : vector<64x128xf32> to vector<64xf32>
    %35 = vector.shape_cast %34 : vector<64xf32> to vector<64x1xf32>
    %36 = vector.broadcast %35 : vector<64x1xf32> to vector<64x128xf32>
    %37 = arith.subf %33, %36 : vector<64x128xf32>
    %38 = math.exp %37 : vector<64x128xf32>
    %cst_15 = arith.constant dense<0.000000e+00> : vector<64xf32>
    %39 = vector.multi_reduction <add>, %38, %cst_15 [1] : vector<64x128xf32> to vector<64xf32>
    %40 = vector.shape_cast %39 : vector<64xf32> to vector<64x1xf32>
    %41 = math.log %40 : vector<64x1xf32>
    %42 = arith.addf %35, %41 : vector<64x1xf32>
    %43 = vector.broadcast %42 : vector<64x1xf32> to vector<64x128xf32>
    %44 = arith.subf %33, %43 : vector<64x128xf32>
    %45 = tpu.iota {dimensions = array<i32: 1>} : vector<64x384xi32>
    %46 = vector.broadcast %1 : vector<64x1xi32> to vector<64x384xi32>
    %47 = arith.cmpi eq, %45, %46 : vector<64x384xi32>
    %cst_16 = arith.constant 0.000000e+00 : f32
    %48 = vector.broadcast %cst_16 : f32 to vector<64x384xf32>
    %49 = arith.select %47, %20, %48 : vector<64x384xi1>, vector<64x384xf32>
    %cst_17 = arith.constant dense<0.000000e+00> : vector<64xf32>
    %50 = vector.multi_reduction <add>, %49, %cst_17 [1] : vector<64x384xf32> to vector<64xf32>
    %51 = vector.shape_cast %50 : vector<64xf32> to vector<64x1xf32>
    %52 = vector.extract_strided_slice %20 {offsets = [0, 257], sizes = [64, 1], strides = [1, 1]} : vector<64x384xf32> to vector<64x1xf32>
    %53 = vector.extract_strided_slice %20 {offsets = [0, 256], sizes = [64, 1], strides = [1, 1]} : vector<64x384xf32> to vector<64x1xf32>
    %c256_i32 = arith.constant 256 : i32
    %54 = vector.broadcast %c256_i32 : i32 to vector<64x1xi32>
    %55 = arith.subi %1, %54 : vector<64x1xi32>
    %56 = tpu.iota {dimensions = array<i32: 1>} : vector<64x128xi32>
    %57 = vector.broadcast %55 : vector<64x1xi32> to vector<64x128xi32>
    %58 = arith.cmpi eq, %56, %57 : vector<64x128xi32>
    %cst_18 = arith.constant 0.000000e+00 : f32
    %59 = vector.broadcast %cst_18 : f32 to vector<64x128xf32>
    %60 = arith.select %58, %32, %59 : vector<64x128xi1>, vector<64x128xf32>
    %cst_19 = arith.constant dense<0.000000e+00> : vector<64xf32>
    %61 = vector.multi_reduction <add>, %60, %cst_19 [1] : vector<64x128xf32> to vector<64xf32>
    %62 = vector.shape_cast %61 : vector<64xf32> to vector<64x1xf32>
    %c384_i32 = arith.constant 384 : i32
    %63 = vector.broadcast %c384_i32 : i32 to vector<64x1xi32>
    %64 = arith.subi %1, %63 : vector<64x1xi32>
    %65 = tpu.iota {dimensions = array<i32: 1>} : vector<64x128xi32>
    %66 = vector.broadcast %64 : vector<64x1xi32> to vector<64x128xi32>
    %67 = arith.cmpi eq, %65, %66 : vector<64x128xi32>
    %cst_20 = arith.constant 0.000000e+00 : f32
    %68 = vector.broadcast %cst_20 : f32 to vector<64x128xf32>
    %69 = arith.select %67, %44, %68 : vector<64x128xi1>, vector<64x128xf32>
    %cst_21 = arith.constant dense<0.000000e+00> : vector<64xf32>
    %70 = vector.multi_reduction <add>, %69, %cst_21 [1] : vector<64x128xf32> to vector<64xf32>
    %71 = vector.shape_cast %70 : vector<64xf32> to vector<64x1xf32>
    %c256_i32_22 = arith.constant 256 : i32
    %72 = vector.broadcast %c256_i32_22 : i32 to vector<64x1xi32>
    %73 = arith.cmpi slt, %1, %72 : vector<64x1xi32>
    %c256_i32_23 = arith.constant 256 : i32
    %74 = vector.broadcast %c256_i32_23 : i32 to vector<64x1xi32>
    %75 = arith.cmpi sge, %1, %74 : vector<64x1xi32>
    %c384_i32_24 = arith.constant 384 : i32
    %76 = vector.broadcast %c384_i32_24 : i32 to vector<64x1xi32>
    %77 = arith.cmpi slt, %1, %76 : vector<64x1xi32>
    %78 = arith.andi %75, %77 : vector<64x1xi1>
    %79 = arith.addf %52, %62 : vector<64x1xf32>
    %80 = arith.addf %53, %71 : vector<64x1xf32>
    %81 = arith.select %78, %79, %80 : vector<64x1xi1>, vector<64x1xf32>
    %82 = arith.select %73, %51, %81 : vector<64x1xi1>, vector<64x1xf32>
    %cst_25 = arith.constant 0.000000e+00 : f32
    %83 = vector.broadcast %cst_25 : f32 to vector<64x1xf32>
    %84 = arith.subf %83, %82 : vector<64x1xf32>
    %85 = vector.shape_cast %84 : vector<64x1xf32> to vector<64x1xf32>
    %86 = vector.broadcast %85 : vector<64x1xf32> to vector<64x128xf32>
    %c0_26 = arith.constant 0 : index
    %c0_27 = arith.constant 0 : index
    %87 = vector.load %arg6[%c0_26, %c0_27] : memref<64x128xf32, #tpu.memory_space<vmem>>, vector<64x128xf32>
    tpu.vector_store %arg6[%c0_26, %c0_27], %86 {strides = array<i32>} : memref<64x128xf32, #tpu.memory_space<vmem>>, vector<64x128xf32>,
    return
  }
  func.func @transform_0(%arg0: i32) -> (i32, i32) {
    %c0_i32 = arith.constant 0 : i32
    %c0_i32_0 = arith.constant 0 : i32
    return %arg0, %c0_i32 : i32, i32
  }
  func.func @transform_1(%arg0: i32) -> (i32, i32) {
    %c0_i32 = arith.constant 0 : i32
    %c0_i32_0 = arith.constant 0 : i32
    return %arg0, %c0_i32 : i32, i32
  }
  func.func @transform_2(%arg0: i32) -> (i32, i32) {
    %c0_i32 = arith.constant 0 : i32
    %c0_i32_0 = arith.constant 0 : i32
    %c0_i32_1 = arith.constant 0 : i32
    return %c0_i32, %c0_i32_0 : i32, i32
  }
  func.func @transform_3(%arg0: i32) -> (i32, i32) {
    %c0_i32 = arith.constant 0 : i32
    %c0_i32_0 = arith.constant 0 : i32
    %c0_i32_1 = arith.constant 0 : i32
    return %c0_i32, %c0_i32_0 : i32, i32
  }
  func.func @transform_4(%arg0: i32) -> (i32, i32) {
    %c0_i32 = arith.constant 0 : i32
    %c0_i32_0 = arith.constant 0 : i32
    %c0_i32_1 = arith.constant 0 : i32
    return %c0_i32, %c0_i32_0 : i32, i32
  }
  func.func @transform_5(%arg0: i32) -> (i32, i32) {
    %c0_i32 = arith.constant 0 : i32
    %c0_i32_0 = arith.constant 0 : i32
    return %arg0, %c0_i32 : i32, i32
  }
}

</mosaic_0001>

<bundles_post_ra>
// kernel: adaptive_logsoftmax_nll.1
= control target key start
LH: loop header
LB: loop body
LE: loop exit
PB: predicated region body
PF: predicated region fallthrough
CT: control target
= control target key end

     0   :  { %v1617_v3 = vmov 0.0   ;;  %vm328_vm0 = vcmask 523264   ;;  %s1619_s15 = smov 127   ;;  %s2945_s2 = inlined_call_operand.vmem [shape: f32[128,192], index: 2, kind: input, shape index: {}]   ;;  %s2946_s3 = inlined_call_operand.vmem [shape: f32[192,640], index: 3, kind: input, shape index: {}]   ;;  %s2947_s0 = inlined_call_operand.vmem [shape: f32[64,128], index: 0, kind: input, shape index: {}]   ;;  %s2948_s1 = inlined_call_operand.vmem [shape: s32[64,1], index: 1, kind: input, shape index: {}]   ;;  %s2949_s4 = inlined_call_operand.vmem [shape: f32[1,640], index: 4, kind: input, shape index: {}]   ;;  %s2950_s5 = inlined_call_operand.vmem [shape: f32[64,128], index: 5, kind: output, shape index: {}]  }
   0x1   :  { %v67_v0 = vld [vmem:[%s2945_s2 + $0xf8] sm:$0xff]  ;;  %v66_v1 = vld [vmem:[%s2945_s2 + $0xf0] sm:$0xff]  ;;  %v65_v2 = vld [vmem:[%s2945_s2 + $0xe8] sm:$0xff]  ;;  %132 = vmatprep.mubr.f32.mxu0 %v1617_v3 }
   0x2   :  { %68 = vmatprep.subr.mxu0 %v67_v0  ;;  %v64_v4 = vld [vmem:[%s2945_s2 + $0xe0] sm:$0xff]  ;;  %v63_v5 = vld [vmem:[%s2945_s2 + $0xd8] sm:$0xff]  ;;  %v62_v6 = vld [vmem:[%s2945_s2 + $0xd0] sm:$0xff] }
   0x3   :  { %69 = vmatpush1.msra.mxu0 %v66_v1  ;;  %v61_v7 = vld [vmem:[%s2945_s2 + $0xc8] sm:$0xff]  ;;  %v60_v8 = vld [vmem:[%s2945_s2 + $0xc0] sm:$0xff]  ;;  %v59_v9 = vld [vmem:[%s2945_s2 + $0xb8] sm:$0xff] }
   0x4   :  { %70 = vmatprep.subr.mxu0 %v65_v2  ;;  %v58_v10 = vld [vmem:[%s2945_s2 + $0xb0] sm:$0xff]  ;;  %v57_v11 = vld [vmem:[%s2945_s2 + $0xa8] sm:$0xff]  ;;  %v56_v12 = vld [vmem:[%s2945_s2 + $0xa0] sm:$0xff] }
   0x5   :  { %71 = vmatpush1.msra.mxu0 %v64_v4  ;;  %v55_v13 = vld [vmem:[%s2945_s2 + $0x98] sm:$0xff]  ;;  %v54_v14 = vld [vmem:[%s2945_s2 + $0x90] sm:$0xff]  ;;  %v53_v15 = vld [vmem:[%s2945_s2 + $0x88] sm:$0xff] }
   0x6   :  { %72 = vmatprep.subr.mxu0 %v63_v5  ;;  %v52_v16 = vld [vmem:[%s2945_s2 + $0x80] sm:$0xff]  ;;  %v256_v18 = vld [vmem:[%s2946_s3 + $0x258] sm:$0xff]  ;;  %v50_v21 = vld [vmem:[%s2945_s2 + $0x70] sm:$0xff] }
   0x7   :  { %73 = vmatpush1.msra.mxu0 %v62_v6  ;;  %v257_v17 = vld [vmem:[%s2946_s3 + $0x260] sm:$0xff]  ;;  %v51_v19 = vld [vmem:[%s2945_s2 + $0x78] sm:$0xff]  ;;  %v251_v22 = vld [vmem:[%s2946_s3 + $0x230] sm:$0xff] }
   0x8   :  { %74 = vmatprep.subr.mxu0 %v61_v7  ;;  %353 = vmatprep.subr.mxu1 %v257_v17  ;;  %v252_v20 = vld [vmem:[%s2946_s3 + $0x238] sm:$0xff]  ;;  %v247_v23 = vld [vmem:[%s2946_s3 + $0x210] sm:$0xff]  ;;  %v49_v24 = vld [vmem:[%s2945_s2 + $0x68] sm:$0xff] }
   0x9   :  { %75 = vmatpush1.msra.mxu0 %v60_v8  ;;  %354 = vmatpush1.msra.mxu1 %v256_v18  ;;  %v246_v25 = vld [vmem:[%s2946_s3 + $0x208] sm:$0xff]  ;;  %v48_v26 = vld [vmem:[%s2945_s2 + $0x60] sm:$0xff]  ;;  %v47_v28 = vld [vmem:[%s2945_s2 + $0x58] sm:$0xff] }
   0xa   :  { %76 = vmatprep.subr.mxu0 %v59_v9  ;;  %355 = vmatprep.subr.mxu1 %v252_v20  ;;  %v242_v27 = vld [vmem:[%s2946_s3 + $0x1e8] sm:$0xff]  ;;  %v241_v29 = vld [vmem:[%s2946_s3 + $0x1e0] sm:$0xff]  ;;  %v46_v30 = vld [vmem:[%s2945_s2 + $0x50] sm:$0xff] }
   0xb   :  { %77 = vmatpush1.msra.mxu0 %v58_v10  ;;  %356 = vmatpush1.msra.mxu1 %v251_v22  ;;  %v237_v31 = vld [vmem:[%s2946_s3 + $0x1c0] sm:$0xff]  ;;  %v45_v32 = vld [vmem:[%s2945_s2 + $0x48] sm:$0xff]  ;;  %v236_v33 = vld [vmem:[%s2946_s3 + $0x1b8] sm:$0xff] }
   0xc   :  { %78 = vmatprep.subr.mxu0 %v57_v11  ;;  %357 = vmatprep.subr.mxu1 %v247_v23  ;;  %v44_v34 = vld [vmem:[%s2945_s2 + $0x40] sm:$0xff]  ;;  %v232_v35 = vld [vmem:[%s2946_s3 + $0x198] sm:$0xff]  ;;  %v231_v37 = vld [vmem:[%s2946_s3 + $0x190] sm:$0xff] }
   0xd   :  { %79 = vmatpush1.msra.mxu0 %v56_v12  ;;  %358 = vmatpush1.msra.mxu1 %v246_v25  ;;  %v43_v36 = vld [vmem:[%s2945_s2 + $0x38] sm:$0xff]  ;;  %v42_v38 = vld [vmem:[%s2945_s2 + $0x30] sm:$0xff]  ;;  %v41_v40 = vld [vmem:[%s2945_s2 + $0x28] sm:$0xff] }
   0xe   :  { %80 = vmatprep.subr.mxu0 %v55_v13  ;;  %359 = vmatprep.subr.mxu1 %v242_v27  ;;  %v227_v39 = vld [vmem:[%s2946_s3 + $0x170] sm:$0xff]  ;;  %v226_v41 = vld [vmem:[%s2946_s3 + $0x168] sm:$0xff]  ;;  %v40_v42 = vld [vmem:[%s2945_s2 + $0x20] sm:$0xff] }
   0xf   :  { %81 = vmatpush1.msra.mxu0 %v54_v14  ;;  %360 = vmatpush1.msra.mxu1 %v241_v29  ;;  %v222_v43 = vld [vmem:[%s2946_s3 + $0x148] sm:$0xff]  ;;  %v39_v44 = vld [vmem:[%s2945_s2 + $0x18] sm:$0xff]  ;;  %v221_v45 = vld [vmem:[%s2946_s3 + $0x140] sm:$0xff] }
  0x10   :  { %82 = vmatprep.subr.mxu0 %v53_v15  ;;  %361 = vmatprep.subr.mxu1 %v237_v31  ;;  %v38_v46 = vld [vmem:[%s2945_s2 + $0x10] sm:$0xff]  ;;  %v217_v47 = vld [vmem:[%s2946_s3 + $0x120] sm:$0xff]  ;;  %v37_v48 = vld [vmem:[%s2945_s2 + $0x8] sm:$0xff] }
  0x11   :  { %83 = vmatpush1.msra.mxu0 %v52_v16  ;;  %362 = vmatpush1.msra.mxu1 %v236_v33  ;;  %v216_v49 = vld [vmem:[%s2946_s3 + $0x118] sm:$0xff]  ;;  %v36_v50 = vld [vmem:[%s2945_s2] sm:$0xff]  ;;  %v259_v53 = vld [vmem:[%s2946_s3 + $0x270] sm:$0xff] }
  0x12   :  { %84 = vmatprep.subr.mxu0 %v51_v19  ;;  %363 = vmatprep.subr.mxu1 %v232_v35  ;;  %v212_v51 = vld [vmem:[%s2946_s3 + $0xf8] sm:$0xff]  ;;  %v20_v52 = vld [vmem:[%s2947_s0] sm:$0xff]  ;;  %v258_v54 = vld [vmem:[%s2946_s3 + $0x268] sm:$0xff] }
  0x13   :  { %85 = vmatpush1.msra.mxu0 %v50_v21  ;;  %364 = vmatpush1.msra.mxu1 %v231_v37  ;;  %v254_v55 = vld [vmem:[%s2946_s3 + $0x248] sm:$0xff]  ;;  %v211_v56 = vld [vmem:[%s2946_s3 + $0xf0] sm:$0xff]  ;;  %v253_v57 = vld [vmem:[%s2946_s3 + $0x240] sm:$0xff] }
  0x14   :  { %86 = vmatprep.subr.mxu0 %v49_v24  ;;  %365 = vmatprep.subr.mxu1 %v227_v39  ;;  %v207_v58 = vld [vmem:[%s2946_s3 + $0xd0] sm:$0xff]  ;;  %v21_v59 = vld [vmem:[%s2947_s0 + $0x8] sm:$0xff]  ;;  %v249_v60 = vld [vmem:[%s2946_s3 + $0x220] sm:$0xff] }
  0x15   :  { %87 = vmatpush1.msra.mxu0 %v48_v26  ;;  %366 = vmatpush1.msra.mxu1 %v226_v41  ;;  %v248_v61 = vld [vmem:[%s2946_s3 + $0x218] sm:$0xff]  ;;  %v206_v63 = vld [vmem:[%s2946_s3 + $0xc8] sm:$0xff]  ;;  %v243_v0 = vld [vmem:[%s2946_s3 + $0x1f0] sm:$0xff] }
  0x16   :  { %88 = vmatprep.subr.mxu0 %v47_v28  ;;  %367 = vmatprep.subr.mxu1 %v222_v43  ;;  %v244_v62 = vld [vmem:[%s2946_s3 + $0x1f8] sm:$0xff]  ;;  %v202_v1 = vld [vmem:[%s2946_s3 + $0xa8] sm:$0xff]  ;;  %v22_v2 = vld [vmem:[%s2947_s0 + $0x10] sm:$0xff] }
  0x17   :  { %89 = vmatpush1.msra.mxu0 %v46_v30  ;;  %368 = vmatpush1.msra.mxu1 %v221_v45  ;;  %v239_v4 = vld [vmem:[%s2946_s3 + $0x1d0] sm:$0xff]  ;;  %v238_v5 = vld [vmem:[%s2946_s3 + $0x1c8] sm:$0xff]  ;;  %v201_v7 = vld [vmem:[%s2946_s3 + $0xa0] sm:$0xff] }
  0x18   :  { %90 = vmatprep.subr.mxu0 %v45_v32  ;;  %369 = vmatprep.subr.mxu1 %v217_v47  ;;  %v234_v6 = vld [vmem:[%s2946_s3 + $0x1a8] sm:$0xff]  ;;  %v233_v8 = vld [vmem:[%s2946_s3 + $0x1a0] sm:$0xff]  ;;  %v23_v10 = vld [vmem:[%s2947_s0 + $0x18] sm:$0xff] }
  0x19   :  { %91 = vmatpush1.msra.mxu0 %v44_v34  ;;  %370 = vmatpush1.msra.mxu1 %v216_v49  ;;  %v197_v9 = vld [vmem:[%s2946_s3 + $0x80] sm:$0xff]  ;;  %v228_v12 = vld [vmem:[%s2946_s3 + $0x178] sm:$0xff]  ;;  %v223_v15 = vld [vmem:[%s2946_s3 + $0x150] sm:$0xff] }
  0x1a   :  { %92 = vmatprep.subr.mxu0 %v43_v36  ;;  %371 = vmatprep.subr.mxu1 %v212_v51  ;;  %v229_v11 = vld [vmem:[%s2946_s3 + $0x180] sm:$0xff]  ;;  %v224_v13 = vld [vmem:[%s2946_s3 + $0x158] sm:$0xff]  ;;  %v219_v18 = vld [vmem:[%s2946_s3 + $0x130] sm:$0xff] }
  0x1b   :  { %93 = vmatpush1.msra.mxu0 %v42_v38  ;;  %372 = vmatpush1.msra.mxu1 %v211_v56  ;;  %v196_v14 = vld [vmem:[%s2946_s3 + $0x78] sm:$0xff]  ;;  %v24_v17 = vld [vmem:[%s2947_s0 + $0x20] sm:$0xff]  ;;  %v218_v19 = vld [vmem:[%s2946_s3 + $0x128] sm:$0xff] }
  0x1c   :  { %94 = vmatprep.subr.mxu0 %v41_v40  ;;  %373 = vmatprep.subr.mxu1 %v207_v58  ;;  %v192_v16 = vld [vmem:[%s2946_s3 + $0x58] sm:$0xff]  ;;  %v214_v20 = vld [vmem:[%s2946_s3 + $0x108] sm:$0xff]  ;;  %v191_v21 = vld [vmem:[%s2946_s3 + $0x50] sm:$0xff] }
  0x1d   :  { %95 = vmatpush1.msra.mxu0 %v40_v42  ;;  %374 = vmatpush1.msra.mxu1 %v206_v63  ;;  %v213_v22 = vld [vmem:[%s2946_s3 + $0x100] sm:$0xff]  ;;  %v187_v23 = vld [vmem:[%s2946_s3 + $0x30] sm:$0xff]  ;;  %v25_v24 = vld [vmem:[%s2947_s0 + $0x28] sm:$0xff] }
  0x1e   :  { %96 = vmatprep.subr.mxu0 %v39_v44  ;;  %375 = vmatprep.subr.mxu1 %v202_v1  ;;  %v209_v25 = vld [vmem:[%s2946_s3 + $0xe0] sm:$0xff]  ;;  %v208_v26 = vld [vmem:[%s2946_s3 + $0xd8] sm:$0xff]  ;;  %v186_v28 = vld [vmem:[%s2946_s3 + $0x28] sm:$0xff] }
  0x1f   :  { %97 = vmatpush1.msra.mxu0 %v38_v46  ;;  %376 = vmatpush1.msra.mxu1 %v201_v7  ;;  %v204_v27 = vld [vmem:[%s2946_s3 + $0xb8] sm:$0xff]  ;;  %v203_v29 = vld [vmem:[%s2946_s3 + $0xb0] sm:$0xff]  ;;  %v182_v30 = vld [vmem:[%s2946_s3 + $0x8] sm:$0xff] }
  0x20   :  { %98 = vmatprep.subr.mxu0 %v37_v48  ;;  %377 = vmatprep.subr.mxu1 %v197_v9  ;;  %v26_v31 = vld [vmem:[%s2947_s0 + $0x30] sm:$0xff]  ;;  %v198_v33 = vld [vmem:[%s2946_s3 + $0x88] sm:$0xff]  ;;  %v181_v35 = vld [vmem:[%s2946_s3] sm:$0xff] }
  0x21   :  { %99 = vmatpush1.msra.mxu0 %v36_v50  ;;  %378 = vmatpush1.msra.mxu1 %v196_v14  ;;  %v199_v32 = vld [vmem:[%s2946_s3 + $0x90] sm:$0xff]  ;;  %v194_v34 = vld [vmem:[%s2946_s3 + $0x68] sm:$0xff]  ;;  %v193_v36 = vld [vmem:[%s2946_s3 + $0x60] sm:$0xff] }
  0x22   :  { %133 = vmatmul.mubr.f32.vlgmr.msra.gmra.mxu0 %v20_v52  ;;  %466 = vmatprep.subr.mxu0 %v259_v53  ;;  %v297_v37 = vld [vmem:[%s2946_s3 + $0x3a0] sm:$0xff]  ;;  %v27_v38 = vld [vmem:[%s2947_s0 + $0x38] sm:$0xff]  ;;  %v183_v44 = vld [vmem:[%s2946_s3 + $0x10] sm:$0xff] }
  0x23   :  { %138 = vmatprep.mubr.f32.mxu0 %v1617_v3  ;;  %467 = vmatpush1.msra.mxu0 %v258_v54  ;;  %v189_v39 = vld [vmem:[%s2946_s3 + $0x40] sm:$0xff]  ;;  %v188_v40 = vld [vmem:[%s2946_s3 + $0x38] sm:$0xff]  ;;  %v291_v45 = vld [vmem:[%s2946_s3 + $0x370] sm:$0xff] }
  0x24   :  { %468 = vmatprep.subr.mxu0 %v254_v55  ;;  %379 = vmatprep.subr.mxu1 %v192_v16  ;;  %v296_v41 = vld [vmem:[%s2946_s3 + $0x398] sm:$0xff]  ;;  %v299_v46 = vld [vmem:[%s2946_s3 + $0x3b0] sm:$0xff]  ;;  %v298_v48 = vld [vmem:[%s2946_s3 + $0x3a8] sm:$0xff] }
  0x25   :  { %469 = vmatpush1.msra.mxu0 %v253_v57  ;;  %380 = vmatpush1.msra.mxu1 %v191_v21  ;;  %v184_v42 = vld [vmem:[%s2946_s3 + $0x18] sm:$0xff]  ;;  %v287_v47 = vld [vmem:[%s2946_s3 + $0x350] sm:$0xff]  ;;  %v286_v49 = vld [vmem:[%s2946_s3 + $0x348] sm:$0xff] }
  0x26   :  { %139 = vmatmul.mubr.f32.gmra.mxu0 %v21_v59  ;;  %470 = vmatprep.subr.mxu0 %v249_v60  ;;  %v292_v43 = vld [vmem:[%s2946_s3 + $0x378] sm:$0xff]  ;;  %v294_v50 = vld [vmem:[%s2946_s3 + $0x388] sm:$0xff]  ;;  %v293_v52 = vld [vmem:[%s2946_s3 + $0x380] sm:$0xff] }
  0x27   :  { %144 = vmatprep.mubr.f32.mxu0 %v1617_v3  ;;  %471 = vmatpush1.msra.mxu0 %v248_v61  ;;  %v282_v51 = vld [vmem:[%s2946_s3 + $0x328] sm:$0xff]  ;;  %v281_v53 = vld [vmem:[%s2946_s3 + $0x320] sm:$0xff]  ;;  %v288_v56 = vld [vmem:[%s2946_s3 + $0x358] sm:$0xff] }
  0x28   :  { %472 = vmatprep.subr.mxu0 %v244_v62  ;;  %381 = vmatprep.subr.mxu1 %v187_v23  ;;  %v289_v54 = vld [vmem:[%s2946_s3 + $0x360] sm:$0xff]  ;;  %v276_v57 = vld [vmem:[%s2946_s3 + $0x2f8] sm:$0xff]  ;;  %v283_v60 = vld [vmem:[%s2946_s3 + $0x330] sm:$0xff] }
  0x29   :  { %473 = vmatpush1.msra.mxu0 %v243_v0  ;;  %382 = vmatpush1.msra.mxu1 %v186_v28  ;;  %v277_v55 = vld [vmem:[%s2946_s3 + $0x300] sm:$0xff]  ;;  %v284_v58 = vld [vmem:[%s2946_s3 + $0x338] sm:$0xff]  ;;  %v271_v61 = vld [vmem:[%s2946_s3 + $0x2d0] sm:$0xff] }
  0x2a   :  { %145 = vmatmul.mubr.f32.gmra.mxu0 %v22_v2  ;;  %474 = vmatprep.subr.mxu0 %v239_v4  ;;  %v272_v59 = vld [vmem:[%s2946_s3 + $0x2d8] sm:$0xff]  ;;  %v279_v62 = vld [vmem:[%s2946_s3 + $0x310] sm:$0xff]  ;;  %v278_v0 = vld [vmem:[%s2946_s3 + $0x308] sm:$0xff] }
  0x2b   :  { %150 = vmatprep.mubr.f32.mxu0 %v1617_v3  ;;  %475 = vmatpush1.msra.mxu0 %v238_v5  ;;  %v267_v63 = vld [vmem:[%s2946_s3 + $0x2b0] sm:$0xff]  ;;  %v274_v1 = vld [vmem:[%s2946_s3 + $0x2e8] sm:$0xff]  ;;  %v273_v2 = vld [vmem:[%s2946_s3 + $0x2e0] sm:$0xff] }
  0x2c   :  { %476 = vmatprep.subr.mxu0 %v234_v6  ;;  %383 = vmatprep.subr.mxu1 %v182_v30  ;;  %v266_v4 = vld [vmem:[%s2946_s3 + $0x2a8] sm:$0xff]  ;;  %v269_v5 = vld [vmem:[%s2946_s3 + $0x2c0] sm:$0xff]  ;;  %v268_v7 = vld [vmem:[%s2946_s3 + $0x2b8] sm:$0xff] }
  0x2d   :  { %477 = vmatpush1.msra.mxu0 %v233_v8  ;;  %384 = vmatpush1.msra.mxu1 %v181_v35  ;;  %v262_v6 = vld [vmem:[%s2946_s3 + $0x288] sm:$0xff]  ;;  %v261_v8 = vld [vmem:[%s2946_s3 + $0x280] sm:$0xff]  ;;  %v264_v9 = vld [vmem:[%s2946_s3 + $0x298] sm:$0xff] }
  0x2e   :  { %151 = vmatmul.mubr.f32.gmra.mxu0 %v23_v10  ;;  %478 = vmatprep.subr.mxu0 %v229_v11  ;;  %v263_v10 = vld [vmem:[%s2946_s3 + $0x290] sm:$0xff]  ;;  %v1618_v11 = vmov 0   ;;  %v2081_v14 = vld [vmem:[%s2948_s1] sm:$0xff]  ;;  %v260_v28 = vld [vmem:[%s2946_s3 + $0x278] sm:$0xff] }
  0x2f   :  { %156 = vmatprep.mubr.f32.mxu0 %v1617_v3  ;;  %479 = vmatpush1.msra.mxu0 %v228_v12  ;;  %v2070_v12 = vld [vmem:[%s2948_s1 + $0x8] sm:$0xff]  ;;  %v255_v30 = vld [vmem:[%s2946_s3 + $0x250] sm:$0xff] }
  0x30   :  { %480 = vmatprep.subr.mxu0 %v224_v13  ;;  %401 = vmatprep.subr.mxu1 %v297_v37  ;;  %v2076_v13 = vld [vmem:[%s2948_s1 + $0x20] sm:$0xff]  ;;  %v1461_v21 = vadd.s32 4294967040, %v2070_v12 }
  0x31   :  { %481 = vmatpush1.msra.mxu0 %v223_v15  ;;  %402 = vmatpush2.msra.mxu1 %v296_v41  ;;  %v2086_v15 = vld [vmem:[%s2948_s1 + $0x10] sm:$0xff]  ;;  %v1464_v16 = vadd.s32 4294967040, %v2076_v13 }
  0x32   :  { %157 = vmatmul.mubr.f32.gmra.mxu0 %v24_v17  ;;  %482 = vmatprep.subr.mxu0 %v219_v18  ;;  %v2093_v17 = vld [vmem:[%s2948_s1 + $0x30] sm:$0xff]  ;;  %v2099_v18 = vld [vmem:[%s2948_s1 + $0x18] sm:$0xff] }
  0x33   :  { %162 = vmatprep.mubr.f32.mxu0 %v1617_v3  ;;  %483 = vmatpush1.msra.mxu0 %v218_v19  ;;  %v1466_v19 = vadd.s32 4294967040, %v2093_v17  ;;  %v1463_v23 = vadd.s32 4294967040, %v2099_v18 }
  0x34   :  { %484 = vmatprep.subr.mxu0 %v214_v20  ;;  %403 = vmatprep.subr.mxu1 %v292_v43  ;;  %v1460_v20 = vadd.s32 4294967040, %v2081_v14 }
  0x35   :  { %485 = vmatpush1.msra.mxu0 %v213_v22  ;;  %404 = vmatpush2.msra.mxu1 %v291_v45  ;;  %v1462_v22 = vadd.s32 4294967040, %v2086_v15 }
  0x36   :  { %163 = vmatmul.mubr.f32.gmra.mxu0 %v25_v24  ;;  %486 = vmatprep.subr.mxu0 %v209_v25  ;;  %v2111_v24 = vld [vmem:[%s2948_s1 + $0x28] sm:$0xff] }
  0x37   :  { %168 = vmatprep.mubr.f32.mxu0 %v1617_v3  ;;  %487 = vmatpush1.msra.mxu0 %v208_v26  ;;  %v1465_v25 = vadd.s32 4294967040, %v2111_v24 }
  0x38   :  { %488 = vmatprep.subr.mxu0 %v204_v27  ;;  %405 = vmatprep.subr.mxu1 %v287_v47 }
  0x39   :  { %489 = vmatpush1.msra.mxu0 %v203_v29  ;;  %406 = vmatpush2.msra.mxu1 %v286_v49 }
  0x3a   :  { %169 = vmatmul.mubr.f32.gmra.mxu0 %v26_v31  ;;  %490 = vmatprep.subr.mxu0 %v199_v32  ;;  %v250_v32 = vld [vmem:[%s2946_s3 + $0x228] sm:$0xff] }
  0x3b   :  { %174 = vmatprep.mubr.f32.mxu0 %v1617_v3  ;;  %491 = vmatpush1.msra.mxu0 %v198_v33 }
  0x3c   :  { %492 = vmatprep.subr.mxu0 %v194_v34  ;;  %407 = vmatprep.subr.mxu1 %v282_v51  ;;  %v245_v34 = vld [vmem:[%s2946_s3 + $0x200] sm:$0xff] }
  0x3d   :  { %493 = vmatpush1.msra.mxu0 %v193_v36  ;;  %408 = vmatpush2.msra.mxu1 %v281_v53  ;;  %v240_v36 = vld [vmem:[%s2946_s3 + $0x1d8] sm:$0xff] }
  0x3e   :  { %175 = vmatmul.mubr.f32.gmra.mxu0 %v27_v38  ;;  %494 = vmatprep.subr.mxu0 %v189_v39  ;;  %v235_v38 = vld [vmem:[%s2946_s3 + $0x1b0] sm:$0xff] }
  0x3f   :  { %495 = vmatpush1.msra.mxu0 %v188_v40  ;;  %409 = vmatprep.subr.mxu1 %v277_v55  ;;  %v230_v40 = vld [vmem:[%s2946_s3 + $0x188] sm:$0xff] }
  0x40   :  { %496 = vmatprep.subr.mxu0 %v184_v42  ;;  %410 = vmatpush2.msra.mxu1 %v276_v57  ;;  %v225_v42 = vld [vmem:[%s2946_s3 + $0x160] sm:$0xff] }
  0x41   :  { %497 = vmatpush1.msra.mxu0 %v183_v44  ;;  %411 = vmatprep.subr.mxu1 %v272_v59  ;;  %v220_v44 = vld [vmem:[%s2946_s3 + $0x138] sm:$0xff]  ;;  %v185_v57 = vld [vmem:[%s2946_s3 + $0x20] sm:$0xff]  ;;  %v295_v59 = vld [vmem:[%s2946_s3 + $0x390] sm:$0xff] }
  0x42   :  { %514 = vmatprep.subr.mxu0 %v299_v46  ;;  %412 = vmatpush2.msra.mxu1 %v271_v61  ;;  %v215_v46 = vld [vmem:[%s2946_s3 + $0x110] sm:$0xff]  ;;  %v285_v61 = vld [vmem:[%s2946_s3 + $0x340] sm:$0xff] }
  0x43   :  { %515 = vmatpush2.msra.mxu0 %v298_v48  ;;  %413 = vmatprep.subr.mxu1 %v267_v63  ;;  %v210_v48 = vld [vmem:[%s2946_s3 + $0xe8] sm:$0xff]  ;;  %v275_v63 = vld [vmem:[%s2946_s3 + $0x2f0] sm:$0xff] }
  0x44   :  { %516 = vmatprep.subr.mxu0 %v294_v50  ;;  %414 = vmatpush2.msra.mxu1 %v266_v4  ;;  %v205_v50 = vld [vmem:[%s2946_s3 + $0xc0] sm:$0xff] }
  0x45   :  { %517 = vmatpush2.msra.mxu0 %v293_v52  ;;  %415 = vmatprep.subr.mxu1 %v262_v6  ;;  %v200_v52 = vld [vmem:[%s2946_s3 + $0x98] sm:$0xff] }
  0x46   :  { %518 = vmatprep.subr.mxu0 %v289_v54  ;;  %416 = vmatpush2.msra.mxu1 %v261_v8  ;;  %v195_v54 = vld [vmem:[%s2946_s3 + $0x70] sm:$0xff] }
  0x47   :  { %519 = vmatpush2.msra.mxu0 %v288_v56  ;;  %579 = vmatprep.subr.mxu1 %v1617_v3  ;;  %v190_v56 = vld [vmem:[%s2946_s3 + $0x48] sm:$0xff] }
  0x48   :  { %520 = vmatprep.subr.mxu0 %v284_v58  ;;  %1480 = vset.pattern.permute.xlu1 %v1618_v11  ;;  %v300_v58 = vld [vmem:[%s2946_s3 + $0x3b8] sm:$0xff] }
  0x49   :  { %521 = vmatpush2.msra.mxu0 %v283_v60  ;;  %1479 = vset.pattern.permute.xlu0 %v1618_v11  ;;  %v290_v60 = vld [vmem:[%s2946_s3 + $0x368] sm:$0xff] }
  0x4a   :  { %522 = vmatprep.subr.mxu0 %v279_v62  ;;  %1052 = vperm.xlu1 %1480, %v2070_v12   ;;  %v280_v62 = vld [vmem:[%s2946_s3 + $0x318] sm:$0xff] }
  0x4b   :  { %523 = vmatpush2.msra.mxu0 %v278_v0  ;;  %1049 = vperm.xlu0 %1479, %v2081_v14   ;;  %v270_v0 = vld [vmem:[%s2946_s3 + $0x2c8] sm:$0xff] }
  0x4c   :  { %524 = vmatprep.subr.mxu0 %v274_v1  ;;  %v265_v1 = vld [vmem:[%s2946_s3 + $0x2a0] sm:$0xff] }
  0x4d   :  { %525 = vmatpush2.msra.mxu0 %v273_v2 }
  0x4e   :  { %526 = vmatprep.subr.mxu0 %v269_v5  ;;  %1055 = vperm.xlu1 %1480, %v2086_v15  }
  0x4f   :  { %527 = vmatpush2.msra.mxu0 %v268_v7  ;;  %1173 = vperm.xlu0 %1479, %v1464_v16   ;;  %v2307_v7 = vld [vmem:[%s2949_s4] sm:$0x1f] }
  0x50   :  { %528 = vmatprep.subr.mxu0 %v264_v9 }
  0x51   :  { %529 = vmatpush2.msra.mxu0 %v263_v10 }
  0x52   :  { %1058 = vperm.xlu1 %1480, %v2099_v18  }
  0x53   :  { %1179 = vperm.xlu0 %1479, %v1466_v19  }
  0x56   :  { %1061 = vperm.xlu1 %1480, %v2076_v13  }
  0x5a   :  { %1161 = vperm.xlu1 %1480, %v1460_v20  }
  0x5e   :  { %1164 = vperm.xlu1 %1480, %v1461_v21  }
  0x62   :  { %1167 = vperm.xlu1 %1480, %v1462_v22  }
  0x66   :  { %1170 = vperm.xlu1 %1480, %v1463_v23  }
  0x6a   :  { %1176 = vperm.xlu1 %1480, %v1465_v25  }
  0xe2   :  { %v2114_v26 = vpop.f32.mrf.mxu0 }
  0xe4   :  { %v2116_v27 = vpop.f32.mrf.mxu0 }
  0xe5   :  { %1436 = vmatprep.mubr.msk.f32.mxu1 %vm328_vm0, %v2116_v27  ;;  %1444 = vmatprep.mubr.msk.f32.mxu0 %vm328_vm0, %v2116_v27 }
  0xe6   :  { %v2125_v29 = vpop.f32.mrf.mxu0  ;;  %418 = vmatmul.mubr.f32.vlgmr.msra.gmra.mxu1 %v2114_v26  ;;  %531 = vmatmul.mubr.f32.vlgmr.msra.gmra.mxu0 %v2114_v26 }
  0xe7   :  { %580 = vmatpush1.msra.mxu1 %v260_v28 }
  0xe8   :  { %581 = vmatprep.subr.mxu1 %v1617_v3  ;;  %v2133_v31 = vpop.f32.mrf.mxu0 }
  0xe9   :  { %582 = vmatpush1.msra.mxu1 %v255_v30  ;;  %1437 = vmatprep.mubr.msk.f32.mxu1 %vm328_vm0, %v2133_v31 }
  0xea   :  { %1445 = vmatprep.mubr.msk.f32.mxu0 %vm328_vm0, %v2133_v31  ;;  %583 = vmatprep.subr.mxu1 %v1617_v3  ;;  %v2143_v33 = vpop.f32.mrf.mxu0 }
  0xeb   :  { %424 = vmatmul.mubr.f32.gmra.mxu1 %v2125_v29  ;;  %537 = vmatmul.mubr.f32.gmra.mxu0 %v2125_v29 }
  0xec   :  { %584 = vmatpush1.msra.mxu1 %v250_v32  ;;  %v2150_v35 = vpop.f32.mrf.mxu0 }
  0xed   :  { %585 = vmatprep.subr.mxu1 %v1617_v3  ;;  %1438 = vmatprep.mubr.msk.f32.mxu1 %vm328_vm0, %v2150_v35 }
  0xee   :  { %586 = vmatpush1.msra.mxu1 %v245_v34  ;;  %1446 = vmatprep.mubr.msk.f32.mxu0 %vm328_vm0, %v2150_v35  ;;  %v2160_v37 = vpop.f32.mrf.mxu0 }
  0xef   :  { %587 = vmatprep.subr.mxu1 %v1617_v3  ;;  %430 = vmatmul.mubr.f32.gmra.mxu1 %v2143_v33 }
  0xf0   :  { %543 = vmatmul.mubr.f32.gmra.mxu0 %v2143_v33  ;;  %588 = vmatpush1.msra.mxu1 %v240_v36  ;;  %v2168_v39 = vpop.f32.mrf.mxu0 }
  0xf1   :  { %589 = vmatprep.subr.mxu1 %v1617_v3  ;;  %1439 = vmatprep.mubr.msk.f32.mxu1 %vm328_vm0, %v2168_v39 }
  0xf2   :  { %590 = vmatpush1.msra.mxu1 %v235_v38  ;;  %1447 = vmatprep.mubr.msk.f32.mxu0 %vm328_vm0, %v2168_v39  ;;  %v2178_v41 = vpop.f32.mrf.mxu0 }
  0xf3   :  { %591 = vmatprep.subr.mxu1 %v1617_v3  ;;  %436 = vmatmul.mubr.f32.gmra.mxu1 %v2160_v37 }
  0xf4   :  { %549 = vmatmul.mubr.f32.gmra.mxu0 %v2160_v37  ;;  %592 = vmatpush1.msra.mxu1 %v230_v40  ;;  %v2186_v43 = vpop.f32.mrf.mxu0 }
  0xf5   :  { %593 = vmatprep.subr.mxu1 %v1617_v3  ;;  %1440 = vmatprep.mubr.msk.f32.mxu1 %vm328_vm0, %v2186_v43 }
  0xf6   :  { %594 = vmatpush1.msra.mxu1 %v225_v42  ;;  %1448 = vmatprep.mubr.msk.f32.mxu0 %vm328_vm0, %v2186_v43  ;;  %v2196_v45 = vpop.f32.mrf.mxu0 }
  0xf7   :  { %595 = vmatprep.subr.mxu1 %v1617_v3  ;;  %442 = vmatmul.mubr.f32.gmra.mxu1 %v2178_v41 }
  0xf8   :  { %555 = vmatmul.mubr.f32.gmra.mxu0 %v2178_v41  ;;  %596 = vmatpush1.msra.mxu1 %v220_v44  ;;  %v2204_v47 = vpop.f32.mrf.mxu0 }
  0xf9   :  { %597 = vmatprep.subr.mxu1 %v1617_v3  ;;  %1441 = vmatprep.mubr.msk.f32.mxu1 %vm328_vm0, %v2204_v47 }
  0xfa   :  { %598 = vmatpush1.msra.mxu1 %v215_v46  ;;  %1449 = vmatprep.mubr.msk.f32.mxu0 %vm328_vm0, %v2204_v47  ;;  %v2214_v49 = vpop.f32.mrf.mxu0 }
  0xfb   :  { %599 = vmatprep.subr.mxu1 %v1617_v3  ;;  %448 = vmatmul.mubr.f32.gmra.mxu1 %v2196_v45 }
  0xfc   :  { %561 = vmatmul.mubr.f32.gmra.mxu0 %v2196_v45  ;;  %600 = vmatpush1.msra.mxu1 %v210_v48  ;;  %v172_v51 = vpop.f32.mrf.mxu0 }
  0xfd   :  { %601 = vmatprep.subr.mxu1 %v1617_v3  ;;  %1442 = vmatprep.mubr.msk.f32.mxu1 %vm328_vm0, %v172_v51 }
  0xfe   :  { %602 = vmatpush1.msra.mxu1 %v205_v50  ;;  %v176_v53 = vpop.f32.mrf.mxu0  ;;  %1450 = vmatprep.mubr.msk.f32.mxu0 %vm328_vm0, %v172_v51 }
  0xff   :  { %603 = vmatprep.subr.mxu1 %v1617_v3  ;;  %454 = vmatmul.mubr.f32.gmra.mxu1 %v2214_v49 }
 0x100   :  { %604 = vmatpush1.msra.mxu1 %v200_v52  ;;  %v178_v55 = vpop.f32.mrf.mxu0  ;;  %567 = vmatmul.mubr.f32.gmra.mxu0 %v2214_v49 }
 0x101   :  { %605 = vmatprep.subr.mxu1 %v1617_v3  ;;  %1443 = vmatprep.mubr.msk.f32.mxu1 %vm328_vm0, %v178_v55 }
 0x102   :  { %606 = vmatpush1.msra.mxu1 %v195_v54  ;;  %1451 = vmatprep.mubr.msk.f32.mxu0 %vm328_vm0, %v178_v55 }
 0x103   :  { %607 = vmatprep.subr.mxu1 %v1617_v3  ;;  %460 = vmatmul.mubr.f32.gmra.mxu1 %v176_v53 }
 0x104   :  { %608 = vmatpush1.msra.mxu1 %v190_v56  ;;  %1452 = vmatprep.mubr.msk.f32.mxu1 %vm328_vm0, %v2116_v27 }
 0x105   :  { %609 = vmatprep.subr.mxu1 %v1617_v3  ;;  %573 = vmatmul.mubr.f32.gmra.mxu0 %v176_v53 }
 0x106   :  { %610 = vmatpush1.msra.mxu1 %v185_v57 }
 0x107   :  { %627 = vmatprep.subr.mxu1 %v1617_v3 }
 0x108   :  { %628 = vmatpush2.msra.mxu1 %v300_v58 }
 0x109   :  { %629 = vmatprep.subr.mxu1 %v1617_v3 }
 0x10a   :  { %630 = vmatpush2.msra.mxu1 %v295_v59 }
 0x10b   :  { %631 = vmatprep.subr.mxu1 %v1617_v3 }
 0x10c   :  { %632 = vmatpush2.msra.mxu1 %v290_v60 }
 0x10d   :  { %633 = vmatprep.subr.mxu1 %v1617_v3 }
 0x10e   :  { %634 = vmatpush2.msra.mxu1 %v285_v61 }
 0x10f   :  { %635 = vmatprep.subr.mxu1 %v1617_v3 }
 0x110   :  { %636 = vmatpush2.msra.mxu1 %v280_v62 }
 0x111   :  { %637 = vmatprep.subr.mxu1 %v1617_v3 }
 0x112   :  { %638 = vmatpush2.msra.mxu1 %v275_v63 }
 0x113   :  { %639 = vmatprep.subr.mxu1 %v1617_v3 }
 0x114   :  { %640 = vmatpush2.msra.mxu1 %v270_v0 }
 0x115   :  { %641 = vmatprep.subr.mxu1 %v1617_v3  ;;  %v2951_v3 = vlaneseq }
 0x116   :  { %642 = vmatpush2.msra.mxu1 %v265_v1 }
 0x117   :  { %644 = vmatmul.mubr.f32.vlgmr.msra.gmra.mxu1 %v2114_v26  ;;  %v2299_v2 = vshrl.u32 %v2951_v3, 7 }
 0x118   :  { %1453 = vmatprep.mubr.msk.f32.mxu1 %vm328_vm0, %v2133_v31 }
 0x119   :  { %v305_v4 = vsub.s32 0, %v2299_v2  ;;  %v309_v5 = vsub.s32 1, %v2299_v2  ;;  %v317_v6 = vsub.s32 3, %v2299_v2  ;;  %v313_v8 = vsub.s32 2, %v2299_v2 }
 0x11b   :  { %649 = vmatmul.mubr.f32.gmra.mxu1 %v2125_v29  ;;  %v2311_v9 = vrot.slane %v2307_v7, %v305_v4  ;;  %v2314_v10 = vrot.slane %v2307_v7, %v309_v5  ;;  %v2317_v11 = vrot.slane %v2307_v7, %v317_v6  ;;  %v2320_v20 = vrot.slane %v2307_v7, %v313_v8 }
 0x11c   :  { %1454 = vmatprep.mubr.msk.f32.mxu1 %vm328_vm0, %v2150_v35 }
 0x11f   :  { %654 = vmatmul.mubr.f32.gmra.mxu1 %v2143_v33 }
 0x120   :  { %1455 = vmatprep.mubr.msk.f32.mxu1 %vm328_vm0, %v2168_v39 }
 0x123   :  { %659 = vmatmul.mubr.f32.gmra.mxu1 %v2160_v37 }
 0x124   :  { %1456 = vmatprep.mubr.msk.f32.mxu1 %vm328_vm0, %v2186_v43 }
 0x127   :  { %664 = vmatmul.mubr.f32.gmra.mxu1 %v2178_v41 }
 0x128   :  { %1457 = vmatprep.mubr.msk.f32.mxu1 %vm328_vm0, %v2204_v47 }
 0x12b   :  { %669 = vmatmul.mubr.f32.gmra.mxu1 %v2196_v45 }
 0x12c   :  { %1458 = vmatprep.mubr.msk.f32.mxu1 %vm328_vm0, %v172_v51 }
 0x12f   :  { %674 = vmatmul.mubr.f32.gmra.mxu1 %v2214_v49 }
 0x130   :  { %1459 = vmatprep.mubr.msk.f32.mxu1 %vm328_vm0, %v178_v55 }
 0x133   :  { %679 = vmatmul.mubr.f32.gmra.mxu1 %v176_v53 }
 0x1a6   :  { %v419_v16 = vpop.f32.mrf.mxu1  ;;  %v532_v19 = vpop.f32.mrf.mxu0 }
 0x1a7   :  { %v2323_v23 = vadd.f32 %v419_v16, %v2311_v9  ;;  %v2332_v27 = vadd.f32 %v532_v19, %v2320_v20 }
 0x1a8   :  { %v421_v21 = vpop.f32.mrf.mxu1  ;;  %v534_v22 = vpop.f32.mrf.mxu0 }
 0x1a9   :  { %v2326_v25 = vadd.f32 %v421_v21, %v2314_v10  ;;  %v2329_v26 = vadd.f32 %v534_v22, %v2317_v11  ;;  %2979 = vst [vmem:[#allocation3_spill] sm:$0xff] %v2332_v27 }
 0x1ab   :  { %2978 = vst [vmem:[#allocation2_spill] sm:$0xff] %v2329_v26  ;;  %v425_v28 = vpop.f32.mrf.mxu1  ;;  %v538_v29 = vpop.f32.mrf.mxu0  ;;  %868 = vmax.xlane.f32.xlu1 %v2329_v26  ;;  %v684_v30 = vmax.f32 %v2323_v23, %v2326_v25 }
 0x1ac   :  { %v2342_v35 = vadd.f32 %v425_v28, %v2311_v9  ;;  %v2356_v44 = vadd.f32 %v538_v29, %v2320_v20 }
 0x1ad   :  { %v427_v31 = vpop.f32.mrf.mxu1  ;;  %v540_v32 = vpop.f32.mrf.mxu0  ;;  %v685_v33 = vmax.f32 %v684_v30, %v2332_v27 }
 0x1ae   :  { %v2339_v34 = vadd.f32 %v427_v31, %v2314_v10  ;;  %2981 = vst [vmem:[#allocation5_spill] sm:$0xff] %v2342_v35  ;;  %v2345_v38 = vadd.f32 %v540_v32, %v2317_v11  ;;  %2984 = vst [vmem:[#allocation8_spill] sm:$0xff] %v2356_v44 }
 0x1af   :  { %v431_v36 = vpop.f32.mrf.mxu1  ;;  %686 = vmax.xlane.f32.xlu0 %v685_v33 }
 0x1b0   :  { %2980 = vst [vmem:[#allocation4_spill] sm:$0xff] %v2339_v34  ;;  %v544_v37 = vpop.f32.mrf.mxu0  ;;  %v688_v40 = vmax.f32 %v2342_v35, %v2339_v34  ;;  %v2350_v41 = vadd.f32 %v431_v36, %v2311_v9 }
 0x1b1   :  { %v433_v39 = vpop.f32.mrf.mxu1  ;;  %v2363_v47 = vadd.f32 %v544_v37, %v2320_v20 }
 0x1b2   :  { %2982 = vst [vmem:[#allocation6_spill] sm:$0xff] %v2350_v41  ;;  %v2353_v42 = vadd.f32 %v433_v39, %v2314_v10  ;;  %v546_v43 = vpop.f32.mrf.mxu0  ;;  %v689_v51 = vmax.f32 %v688_v40, %v2356_v44 }
 0x1b3   :  { %v2359_v45 = vadd.f32 %v546_v43, %v2317_v11  ;;  %v437_v46 = vpop.f32.mrf.mxu1  ;;  %870 = vmax.xlane.f32.xlu0 %v2345_v38  ;;  %2986 = vst [vmem:[#allocation10_spill] sm:$0xff] %v2363_v47 }
 0x1b4   :  { %2983 = vst [vmem:[#allocation7_spill] sm:$0xff] %v2353_v42  ;;  %v550_v48 = vpop.f32.mrf.mxu0  ;;  %v692_v49 = vmax.f32 %v2350_v41, %v2353_v42  ;;  %v2370_v52 = vadd.f32 %v437_v46, %v2311_v9 }
 0x1b5   :  { %2985 = vst [vmem:[#allocation9_spill] sm:$0xff] %v2359_v45  ;;  %872 = vmax.xlane.f32.xlu1 %v2359_v45  ;;  %v439_v50 = vpop.f32.mrf.mxu1  ;;  %v2377_v57 = vadd.f32 %v550_v48, %v2320_v20 }
 0x1b6   :  { %2987 = vst [vmem:[#allocation11_spill] sm:$0xff] %v2370_v52  ;;  %v2373_v53 = vadd.f32 %v439_v50, %v2314_v10  ;;  %v552_v54 = vpop.f32.mrf.mxu0  ;;  %v693_v55 = vmax.f32 %v692_v49, %v2363_v47  ;;  %v2425_v49 = vld [vmem:[%s2948_s1 + $0x38] sm:$0xff] }
 0x1b7   :  { %v443_v56 = vpop.f32.mrf.mxu1  ;;  %690 = vmax.xlane.f32.xlu0 %v689_v51  ;;  %2989 = vst [vmem:[#allocation13_spill] sm:$0xff] %v2377_v57  ;;  %v2382_v60 = vadd.f32 %v552_v54, %v2317_v11  ;;  %v1467_v50 = vadd.s32 4294967040, %v2425_v49 }
 0x1b8   :  { %2988 = vst [vmem:[#allocation12_spill] sm:$0xff] %v2373_v53  ;;  %v556_v58 = vpop.f32.mrf.mxu0  ;;  %v696_v59 = vmax.f32 %v2370_v52, %v2373_v53  ;;  %v2385_v62 = vadd.f32 %v443_v56, %v2311_v9 }
 0x1b9   :  { %2990 = vst [vmem:[#allocation14_spill] sm:$0xff] %v2382_v60  ;;  %694 = vmax.xlane.f32.xlu1 %v693_v55  ;;  %v445_v61 = vpop.f32.mrf.mxu1  ;;  %v2393_v5 = vadd.f32 %v556_v58, %v2320_v20 }
 0x1ba   :  { %2991 = vst [vmem:[#allocation15_spill] sm:$0xff] %v2385_v62  ;;  %v2388_v63 = vadd.f32 %v445_v61, %v2314_v10  ;;  %v558_v0 = vpop.f32.mrf.mxu0  ;;  %v697_v1 = vmax.f32 %v696_v59, %v2377_v57 }
 0x1bb   :  { %v449_v4 = vpop.f32.mrf.mxu1  ;;  %874 = vmax.xlane.f32.xlu0 %v2382_v60  ;;  %v2405_v29 = vadd.f32 %v558_v0, %v2317_v11 }
 0x1bc   :  { %2992 = vst [vmem:[#allocation16_spill] sm:$0xff] %v2388_v63  ;;  %v2396_v6 = vadd.f32 %v449_v4, %v2311_v9  ;;  %v562_v8 = vpop.f32.mrf.mxu0  ;;  %v700_v16 = vmax.f32 %v2385_v62, %v2388_v63 }
 0x1bd   :  { %698 = vmax.xlane.f32.xlu1 %v697_v1  ;;  %v451_v19 = vpop.f32.mrf.mxu1  ;;  %v2408_v30 = vadd.f32 %v562_v8, %v2320_v20 }
 0x1be   :  { %2993 = vst [vmem:[#allocation17_spill] sm:$0xff] %v2396_v6  ;;  %v2401_v21 = vadd.f32 %v451_v19, %v2314_v10  ;;  %v564_v22 = vpop.f32.mrf.mxu0  ;;  %v701_v28 = vmax.f32 %v700_v16, %v2393_v5 }
 0x1bf   :  { %2995 = vst [vmem:[#allocation19_spill] sm:$0xff] %v2408_v30  ;;  %v2414_v33 = vadd.f32 %v564_v22, %v2317_v11  ;;  %v455_v40 = vpop.f32.mrf.mxu1 }
 0x1c0   :  { %2994 = vst [vmem:[#allocation18_spill] sm:$0xff] %v2401_v21  ;;  %702 = vmax.xlane.f32.xlu0 %v701_v28  ;;  %v568_v31 = vpop.f32.mrf.mxu0  ;;  %v704_v32 = vmax.f32 %v2396_v6, %v2401_v21  ;;  %v2430_v19 = vadd.f32 %v455_v40, %v2311_v9 }
 0x1c1   :  { %876 = vmax.xlane.f32.xlu1 %v2405_v29  ;;  %v457_v43 = vpop.f32.mrf.mxu1 }
 0x1c2   :  { %v705_v36 = vmax.f32 %v704_v32, %v2408_v30  ;;  %v570_v37 = vpop.f32.mrf.mxu0  ;;  %v2433_v22 = vadd.f32 %v457_v43, %v2314_v10  ;;  %v321_v43 = vsub.s32 4, %v2299_v2 }
 0x1c3   :  { %v2419_v39 = vadd.f32 %v570_v37, %v2317_v11  ;;  %v461_v46 = vpop.f32.mrf.mxu1 }
 0x1c4   :  { %878 = vmax.xlane.f32.xlu0 %v2414_v33 }
 0x1c5   :  { %706 = vmax.xlane.f32.xlu1 %v705_v36  ;;  %2996 = vst [vmem:[#allocation20_spill] sm:$0xff] %v2419_v39  ;;  %v463_v48 = vpop.f32.mrf.mxu1  ;;  %v2436_v36 = vadd.f32 %v568_v31, %v2320_v20  ;;  %v574_v40 = vpop.f32.mrf.mxu0 }
 0x1c7   :  { %v576_v31 = vpop.f32.mrf.mxu0 }
 0x1c9   :  { %880 = vmax.xlane.f32.xlu1 %v2419_v39 }
 0x1d7   :  { %v645_v51 = vpop.f32.mrf.mxu1 }
 0x1d9   :  { %v647_v54 = vpop.f32.mrf.mxu1 }
 0x1da   :  { %1182 = vperm.xlu1 %1480, %v1467_v50   ;;  %1064 = vperm.xlu0 %1479, %v2111_v24   ;;  %v708_v50 = vmax.f32 %v2430_v19, %v2433_v22  ;;  %v2441_v54 = vadd.f32 %v461_v46, %v2311_v9  ;;  %v322_v9 = vrot.slane %v2307_v7, %v321_v43  ;;  %v2497_v43 = vpop.permute.xlu0 %1049 }
 0x1db   :  { %v650_v55 = vpop.f32.mrf.mxu1  ;;  %v2455_v46 = vadd.f32 %v576_v31, %v2317_v11 }
 0x1dc   :  { %v2459_v2 = vadd.f32 %v645_v51, %v322_v9 }
 0x1dd   :  { %v652_v56 = vpop.f32.mrf.mxu1 }
 0x1de   :  { %v2444_v56 = vadd.f32 %v463_v48, %v2314_v10  ;;  %v2461_v48 = vadd.f32 %v650_v55, %v322_v9 }
 0x1df   :  { %v655_v58 = vpop.f32.mrf.mxu1 }
 0x1e1   :  { %v657_v59 = vpop.f32.mrf.mxu1 }
 0x1e3   :  { %v660_v61 = vpop.f32.mrf.mxu1 }
 0x1e4   :  { %v2469_v7 = vadd.f32 %v660_v61, %v322_v9 }
 0x1e5   :  { %v662_v0 = vpop.f32.mrf.mxu1 }
 0x1e6   :  { %v709_v0 = vmax.f32 %v708_v50, %v2436_v36 }
 0x1e7   :  { %v665_v1 = vpop.f32.mrf.mxu1 }
 0x1e8   :  { %v2475_v51 = vadd.f32 %v665_v1, %v322_v9 }
 0x1e9   :  { %v667_v4 = vpop.f32.mrf.mxu1 }
 0x1ea   :  { %v2449_v4 = vadd.f32 %v574_v40, %v2320_v20  ;;  %v2463_v20 = vpop.permute.xlu1 %1052 }
 0x1eb   :  { %v670_v8 = vpop.f32.mrf.mxu1  ;;  %2997 = vst [vmem:[#allocation21_spill] sm:$0xff] %v2463_v20 }
 0x1ec   :  { %v2477_v55 = vadd.f32 %v670_v8, %v322_v9 }
 0x1ed   :  { %v672_v16 = vpop.f32.mrf.mxu1 }
 0x1ee   :  { %v712_v16 = vmax.f32 %v2441_v54, %v2444_v56  ;;  %v2472_v11 = vpop.permute.xlu1 %1055 }
 0x1ef   :  { %v675_v28 = vpop.f32.mrf.mxu1  ;;  %2998 = vst [vmem:[#allocation22_spill] sm:$0xff] %v2472_v11 }
 0x1f0   :  { %v713_v10 = vmax.f32 %v712_v16, %v2449_v4  ;;  %v2481_v50 = vadd.f32 %v675_v28, %v322_v9 }
 0x1f1   :  { %v677_v32 = vpop.f32.mrf.mxu1 }
 0x1f2   :  { %v2467_v32 = vadd.f32 %v655_v58, %v322_v9  ;;  %2999 = vst [vmem:[#allocation23_spill] sm:$0xff] %v2481_v50  ;;  %v2485_v61 = vpop.permute.xlu1 %1058 }
 0x1f3   :  { %v680_v37 = vpop.f32.mrf.mxu1  ;;  %3000 = vst [vmem:[#allocation24_spill] sm:$0xff] %v2485_v61 }
 0x1f4   :  { %v2483_v58 = vadd.f32 %v680_v37, %v322_v9  ;;  %v2501_v37 = vpop.permute.xlu0 %1173 }
 0x1f5   :  { %v682_v59 = vpop.f32.mrf.mxu1  ;;  %3005 = vst [vmem:[#allocation29_spill] sm:$0xff] %v2501_v37 }
 0x1f6   :  { %v2489_v40 = vpop.permute.xlu1 %1061 }
 0x1f7   :  { %3001 = vst [vmem:[#allocation25_spill] sm:$0xff] %v2489_v40 }
 0x1f8   :  { %v2505_v31 = vpop.permute.xlu0 %1179 }
 0x1f9   :  { %710 = vmax.xlane.f32.xlu0 %v709_v0  ;;  %3007 = vst [vmem:[#allocation31_spill] sm:$0xff] %v2505_v31 }
 0x1fa   :  { %v2491_v1 = vpop.permute.xlu1 %1161 }
 0x1fb   :  { %3002 = vst [vmem:[#allocation26_spill] sm:$0xff] %v2491_v1 }
 0x1fd   :  { %882 = vmax.xlane.f32.xlu0 %v2455_v46 }
 0x1fe   :  { %714 = vmax.xlane.f32.xlu1 %v713_v10  ;;  %v2493_v8 = vpop.permute.xlu1 %1164 }
 0x201   :  { %956 = vmax.xlane.f32.xlu0 %v2459_v2 }
 0x202   :  { %958 = vmax.xlane.f32.xlu1 %v2461_v48  ;;  %v2495_v59 = vpop.permute.xlu1 %1167 }
 0x203   :  { %3003 = vst [vmem:[#allocation27_spill] sm:$0xff] %v2495_v59 }
 0x205   :  { %960 = vmax.xlane.f32.xlu0 %v2467_v32 }
 0x206   :  { %962 = vmax.xlane.f32.xlu1 %v2469_v7  ;;  %v2499_v28 = vpop.permute.xlu1 %1170 }
 0x207   :  { %3004 = vst [vmem:[#allocation28_spill] sm:$0xff] %v2499_v28 }
 0x209   :  { %964 = vmax.xlane.f32.xlu0 %v2475_v51 }
 0x20a   :  { %966 = vmax.xlane.f32.xlu1 %v2477_v55  ;;  %v2503_v0 = vpop.permute.xlu1 %1176 }
 0x20b   :  { %3006 = vst [vmem:[#allocation30_spill] sm:$0xff] %v2503_v0 }
 0x20d   :  { %968 = vmax.xlane.f32.xlu0 %v2481_v50 }
 0x20e   :  { %970 = vmax.xlane.f32.xlu1 %v2483_v58 }
 0x234   :  { %v2507_v16 = vpop.xlane.xlu1 %868 }
 0x235   :  { %3008 = vst [vmem:[#allocation32_spill] sm:$0xff] %v2507_v16  ;;  %v884_v9 = vsub.f32 %v2329_v26, %v2507_v16 }
 0x237   :  { %v892_v10 = vmul.f32 1.442695, %v884_v9 }
 0x238   :  { %v2511_v3 = vpop.xlane.xlu0 %686 }
 0x239   :  { %1481 = vpow2.f32 %v892_v10  ;;  %v716_v61 = vsub.f32 %v2323_v23, %v2511_v3  ;;  %v717_v40 = vsub.f32 %v2326_v25, %v2511_v3  ;;  %v718_v0 = vsub.f32 %v2332_v27, %v2511_v3 }
 0x23b   :  { %v740_v37 = vmul.f32 1.442695, %v716_v61  ;;  %v742_v31 = vmul.f32 1.442695, %v717_v40  ;;  %v744_v28 = vmul.f32 1.442695, %v718_v0 }
 0x23c   :  { %v2519_v20 = vpop.xlane.xlu0 %870 }
 0x23d   :  { %1483 = vpow2.f32 %v740_v37  ;;  %v885_v9 = vsub.f32 %v2345_v38, %v2519_v20 }
 0x23e   :  { %1485 = vpow2.f32 %v742_v31  ;;  %v2523_v10 = vpop.xlane.xlu1 %872 }
 0x23f   :  { %v886_v1 = vsub.f32 %v2359_v45, %v2523_v10  ;;  %v894_v11 = vmul.f32 1.442695, %v885_v9 }
 0x240   :  { %v2527_v26 = vpop.xlane.xlu0 %690 }
 0x241   :  { %v896_v16 = vmul.f32 1.442695, %v886_v1  ;;  %1487 = vpow2.f32 %v894_v11  ;;  %v719_v61 = vsub.f32 %v2342_v35, %v2527_v26  ;;  %v720_v37 = vsub.f32 %v2339_v34, %v2527_v26 }
 0x242   :  { %1489 = vpow2.f32 %v744_v28  ;;  %v2531_v40 = vpop.xlane.xlu1 %694  ;;  %v721_v11 = vsub.f32 %v2356_v44, %v2527_v26 }
 0x243   :  { %v722_v0 = vsub.f32 %v2350_v41, %v2531_v40  ;;  %v723_v31 = vsub.f32 %v2353_v42, %v2531_v40  ;;  %v724_v9 = vsub.f32 %v2363_v47, %v2531_v40  ;;  %v746_v1 = vmul.f32 1.442695, %v719_v61 }
 0x244   :  { %v2543_v35 = vpop.xlane.xlu0 %874  ;;  %1491 = vpow2.f32 %v896_v16  ;;  %v748_v45 = vmul.f32 1.442695, %v720_v37  ;;  %v750_v16 = vmul.f32 1.442695, %v721_v11 }
 0x245   :  { %3009 = vst [vmem:[#allocation33_spill] sm:$0xff] %v2543_v35  ;;  %v752_v28 = vmul.f32 1.442695, %v722_v0  ;;  %v754_v59 = vmul.f32 1.442695, %v723_v31  ;;  %1493 = vpow2.f32 %v746_v1  ;;  %v887_v61 = vsub.f32 %v2382_v60, %v2543_v35 }
 0x246   :  { %v756_v27 = vmul.f32 1.442695, %v724_v9  ;;  %v1482_v34 = vpop.eup %1481  ;;  %v2545_v41 = vpop.xlane.xlu1 %698 }
 0x247   :  { %1495 = vpow2.f32 %v752_v28  ;;  %v725_v42 = vsub.f32 %v2370_v52, %v2545_v41  ;;  %v726_v47 = vsub.f32 %v2373_v53, %v2545_v41  ;;  %908 = vadd.xlane.f32.xlu0 %v1482_v34  ;;  %v727_v34 = vsub.f32 %v2377_v57, %v2545_v41 }
 0x248   :  { %1497 = vpow2.f32 %v754_v59  ;;  %v898_v59 = vmul.f32 1.442695, %v887_v61 }
 0x249   :  { %1499 = vpow2.f32 %v756_v27  ;;  %v758_v0 = vmul.f32 1.442695, %v725_v42  ;;  %v2553_v31 = vpop.xlane.xlu0 %702  ;;  %v760_v9 = vmul.f32 1.442695, %v726_v47  ;;  %v762_v35 = vmul.f32 1.442695, %v727_v34 }
 0x24a   :  { %v1484_v37 = vpop.eup %1483  ;;  %1501 = vpow2.f32 %v748_v45  ;;  %v2555_v1 = vpop.xlane.xlu1 %876  ;;  %v728_v28 = vsub.f32 %v2385_v62, %v2553_v31  ;;  %v729_v53 = vsub.f32 %v2388_v63, %v2553_v31  ;;  %v730_v42 = vsub.f32 %v2393_v5, %v2553_v31 }
 0x24b   :  { %v1486_v52 = vpop.eup %1485  ;;  %v888_v27 = vsub.f32 %v2405_v29, %v2555_v1  ;;  %1503 = vpow2.f32 %v750_v16 }
 0x24c   :  { %1505 = vpow2.f32 %v758_v0  ;;  %v764_v47 = vmul.f32 1.442695, %v728_v28  ;;  %v788_v11 = vadd.f32 %v1486_v52, %v1484_v37  ;;  %v766_v44 = vmul.f32 1.442695, %v729_v53 }
 0x24d   :  { %v900_v45 = vmul.f32 1.442695, %v888_v27  ;;  %1507 = vpow2.f32 %v760_v9  ;;  %v2573_v57 = vpop.xlane.xlu0 %878  ;;  %v768_v0 = vmul.f32 1.442695, %v730_v42 }
 0x24e   :  { %v1488_v62 = vpop.eup %1487  ;;  %v2567_v63 = vpop.xlane.xlu1 %706  ;;  %1509 = vpow2.f32 %v898_v59  ;;  %v889_v28 = vsub.f32 %v2414_v33, %v2573_v57 }
 0x24f   :  { %v1490_v60 = vpop.eup %1489  ;;  %v731_v61 = vsub.f32 %v2396_v6, %v2567_v63  ;;  %v732_v16 = vsub.f32 %v2401_v21, %v2567_v63  ;;  %910 = vadd.xlane.f32.xlu1 %v1488_v62  ;;  %1511 = vpow2.f32 %v900_v45 }
 0x250   :  { %v789_v52 = vadd.f32 %v1490_v60, %v788_v11  ;;  %1513 = vpow2.f32 %v764_v47  ;;  %v733_v60 = vsub.f32 %v2408_v30, %v2567_v63  ;;  %v902_v47 = vmul.f32 1.442695, %v889_v28 }
 0x251   :  { %v770_v37 = vmul.f32 1.442695, %v731_v61  ;;  %v1492_v53 = vpop.eup %1491  ;;  %1515 = vpow2.f32 %v766_v44  ;;  %v772_v9 = vmul.f32 1.442695, %v732_v16 }
 0x252   :  { %790 = vadd.xlane.f32.xlu0 %v789_v52  ;;  %v2577_v34 = vpop.xlane.xlu1 %880  ;;  %v1494_v59 = vpop.eup %1493  ;;  %1517 = vpow2.f32 %v762_v35  ;;  %v774_v16 = vmul.f32 1.442695, %v733_v60 }
 0x253   :  { %v890_v27 = vsub.f32 %v2419_v39, %v2577_v34  ;;  %1519 = vpow2.f32 %v768_v0 }
 0x254   :  { %v1496_v62 = vpop.eup %1495  ;;  %1521 = vpow2.f32 %v770_v37 }
 0x255   :  { %v1498_v42 = vpop.eup %1497  ;;  %v904_v44 = vmul.f32 1.442695, %v890_v27  ;;  %1523 = vpow2.f32 %v772_v9 }
 0x256   :  { %v1500_v45 = vpop.eup %1499  ;;  %912 = vadd.xlane.f32.xlu0 %v1492_v53  ;;  %v796_v11 = vadd.f32 %v1498_v42, %v1496_v62 }
 0x257   :  { %v1502_v61 = vpop.eup %1501  ;;  %1525 = vpow2.f32 %v904_v44 }
 0x258   :  { %v797_v35 = vadd.f32 %v1500_v45, %v796_v11  ;;  %v792_v52 = vadd.f32 %v1502_v61, %v1494_v59  ;;  %v1504_v21 = vpop.eup %1503  ;;  %1527 = vpow2.f32 %v902_v47 }
 0x259   :  { %v1506_v6 = vpop.eup %1505  ;;  %1529 = vpow2.f32 %v774_v16 }
 0x25a   :  { %798 = vadd.xlane.f32.xlu0 %v797_v35  ;;  %v793_v0 = vadd.f32 %v1504_v21, %v792_v52  ;;  %v1508_v39 = vpop.eup %1507  ;;  %v1469_v35 = vadd.s32 4294966912, %v2070_v12  ;;  %v1474_v12 = vadd.s32 4294966912, %v2093_v17 }
 0x25b   :  { %v1510_v30 = vpop.eup %1509  ;;  %v800_v9 = vadd.f32 %v1508_v39, %v1506_v6  ;;  %v2583_v6 = vpop.permute.xlu0 %1064 }
 0x25c   :  { %794 = vadd.xlane.f32.xlu1 %v793_v0  ;;  %v1512_v37 = vpop.eup %1511  ;;  %v1470_v0 = vadd.s32 4294966912, %v2086_v15 }
 0x25d   :  { %v1514_v27 = vpop.eup %1513 }
 0x25e   :  { %916 = vadd.xlane.f32.xlu0 %v1512_v37  ;;  %v1516_v53 = vpop.eup %1515 }
 0x25f   :  { %v1518_v28 = vpop.eup %1517  ;;  %v804_v62 = vadd.f32 %v1516_v53, %v1514_v27  ;;  %v1473_v53 = vadd.s32 4294966912, %v2111_v24 }
 0x260   :  { %914 = vadd.xlane.f32.xlu1 %v1510_v30  ;;  %v1520_v60 = vpop.eup %1519  ;;  %v801_v44 = vadd.f32 %v1518_v28, %v800_v9  ;;  %v1468_v30 = vadd.s32 4294966912, %v2081_v14  ;;  %v1471_v9 = vadd.s32 4294966912, %v2099_v18  ;;  %v1472_v14 = vadd.s32 4294966912, %v2076_v13 }
 0x261   :  { %v1522_v42 = vpop.eup %1521  ;;  %v805_v59 = vadd.f32 %v1520_v60, %v804_v62 }
 0x262   :  { %v1524_v45 = vpop.eup %1523 }
 0x263   :  { %806 = vadd.xlane.f32.xlu0 %v805_v59  ;;  %v808_v47 = vadd.f32 %v1524_v45, %v1522_v42 }
 0x264   :  { %802 = vadd.xlane.f32.xlu1 %v801_v44  ;;  %v1526_v21 = vpop.eup %1525  ;;  %v2609_v44 = vpop.permute.xlu1 %1182 }
 0x265   :  { %v1528_v11 = vpop.eup %1527 }
 0x266   :  { %v1530_v61 = vpop.eup %1529 }
 0x267   :  { %920 = vadd.xlane.f32.xlu0 %v1526_v21  ;;  %v809_v16 = vadd.f32 %v1530_v61, %v808_v47 }
 0x268   :  { %918 = vadd.xlane.f32.xlu1 %v1528_v11 }
 0x26c   :  { %810 = vadd.xlane.f32.xlu1 %v809_v16 }
 0x27d   :  { %1070 = vperm.xlu0 %1479, %v2425_v49  }
 0x281   :  { %1225 = vperm.xlu0 %1479, %v1468_v30  }
 0x282   :  { %v2587_v39 = vpop.xlane.xlu0 %710 }
 0x283   :  { %v734_v15 = vsub.f32 %v2430_v19, %v2587_v39  ;;  %v735_v62 = vsub.f32 %v2433_v22, %v2587_v39  ;;  %v736_v13 = vsub.f32 %v2436_v36, %v2587_v39 }
 0x285   :  { %1228 = vperm.xlu0 %1479, %v1469_v35   ;;  %v776_v18 = vmul.f32 1.442695, %v734_v15  ;;  %v778_v42 = vmul.f32 1.442695, %v735_v62  ;;  %v780_v59 = vmul.f32 1.442695, %v736_v13 }
 0x286   :  { %v2590_v52 = vpop.xlane.xlu0 %882 }
 0x287   :  { %v891_v37 = vsub.f32 %v2455_v46, %v2590_v52  ;;  %v2616_v47 = vpop.xlane.xlu1 %714 }
 0x288   :  { %v737_v16 = vsub.f32 %v2441_v54, %v2616_v47 }
 0x289   :  { %v906_v27 = vmul.f32 1.442695, %v891_v37  ;;  %1231 = vperm.xlu0 %1479, %v1470_v0  }
 0x28a   :  { %v2603_v60 = vpop.xlane.xlu0 %956 }
 0x28b   :  { %1531 = vpow2.f32 %v906_v27  ;;  %v972_v45 = vsub.f32 %v2459_v2, %v2603_v60  ;;  %v738_v27 = vsub.f32 %v2444_v56, %v2616_v47 }
 0x28c   :  { %1533 = vpow2.f32 %v776_v18  ;;  %v739_v18 = vsub.f32 %v2449_v4, %v2616_v47 }
 0x28d   :  { %1234 = vperm.xlu0 %1479, %v1471_v9   ;;  %1535 = vpow2.f32 %v778_v42  ;;  %v980_v11 = vmul.f32 1.442695, %v972_v45  ;;  %v782_v9 = vmul.f32 1.442695, %v737_v16  ;;  %v784_v15 = vmul.f32 1.442695, %v738_v27 }
 0x28e   :  { %v2607_v24 = vpop.xlane.xlu0 %960  ;;  %1537 = vpow2.f32 %v780_v59  ;;  %v786_v45 = vmul.f32 1.442695, %v739_v18 }
 0x28f   :  { %v974_v61 = vsub.f32 %v2467_v32, %v2607_v24  ;;  %1539 = vpow2.f32 %v980_v11 }
 0x291   :  { %1237 = vperm.xlu0 %1479, %v1472_v14   ;;  %v984_v35 = vmul.f32 1.442695, %v974_v61  ;;  %v2628_v14 = vpop.xlane.xlu1 %958 }
 0x292   :  { %v2613_v21 = vpop.xlane.xlu0 %964  ;;  %v973_v61 = vsub.f32 %v2461_v48, %v2628_v14 }
 0x293   :  { %v976_v0 = vsub.f32 %v2475_v51, %v2613_v21  ;;  %1541 = vpow2.f32 %v984_v35 }
 0x294   :  { %1543 = vpow2.f32 %v782_v9  ;;  %v982_v35 = vmul.f32 1.442695, %v973_v61 }
 0x295   :  { %1240 = vperm.xlu0 %1479, %v1473_v53   ;;  %v988_v53 = vmul.f32 1.442695, %v976_v0  ;;  %v2634_v59 = vpop.xlane.xlu1 %962 }
 0x296   :  { %v975_v0 = vsub.f32 %v2469_v7, %v2634_v59 }
 0x297   :  { %1545 = vpow2.f32 %v988_v53 }
 0x298   :  { %v1532_v28 = vpop.eup %1531  ;;  %1547 = vpow2.f32 %v784_v15  ;;  %v986_v9 = vmul.f32 1.442695, %v975_v0 }
 0x299   :  { %922 = vadd.xlane.f32.xlu1 %v1532_v28  ;;  %1243 = vperm.xlu0 %1479, %v1474_v12   ;;  %v1534_v30 = vpop.eup %1533  ;;  %v2638_v16 = vpop.xlane.xlu1 %966 }
 0x29a   :  { %v1536_v37 = vpop.eup %1535  ;;  %v977_v53 = vsub.f32 %v2477_v55, %v2638_v16 }
 0x29b   :  { %v812_v28 = vadd.f32 %v1536_v37, %v1534_v30  ;;  %v1538_v62 = vpop.eup %1537 }
 0x29c   :  { %v1540_v11 = vpop.eup %1539 }
 0x29d   :  { %v813_v13 = vadd.f32 %v1538_v62, %v812_v28  ;;  %v2644_v28 = vpop.xlane.xlu1 %970  ;;  %v990_v62 = vmul.f32 1.442695, %v977_v53  ;;  %v1475_v53 = vadd.s32 4294966912, %v2425_v49 }
 0x29e   :  { %v979_v18 = vsub.f32 %v2483_v58, %v2644_v28 }
 0x2a0   :  { %v1542_v30 = vpop.eup %1541 }
 0x2a1   :  { %v1544_v37 = vpop.eup %1543 }
 0x2a4   :  { %v1546_v27 = vpop.eup %1545 }
 0x2aa   :  { %1067 = vperm.xlu1 %1480, %v2093_v17   ;;  %v2626_v17 = vpop.xlane.xlu0 %968 }
 0x2ab   :  { %v978_v12 = vsub.f32 %v2481_v50, %v2626_v17 }
 0x2ad   :  { %v992_v42 = vmul.f32 1.442695, %v978_v12  ;;  %v1548_v12 = vpop.eup %1547 }
 0x2af   :  { %1549 = vpow2.f32 %v992_v42  ;;  %v816_v42 = vadd.f32 %v1548_v12, %v1544_v37 }
 0x2b0   :  { %1551 = vpow2.f32 %v786_v45  ;;  %v994_v45 = vmul.f32 1.442695, %v979_v18 }
 0x2b1   :  { %1553 = vpow2.f32 %v982_v35 }
 0x2b2   :  { %1555 = vpow2.f32 %v986_v9 }
 0x2b3   :  { %1557 = vpow2.f32 %v990_v62 }
 0x2b4   :  { %1559 = vpow2.f32 %v994_v45 }
 0x2b8   :  { %814 = vadd.xlane.f32.xlu0 %v813_v13 }
 0x2bc   :  { %996 = vadd.xlane.f32.xlu0 %v1540_v11  ;;  %v1550_v15 = vpop.eup %1549 }
 0x2bd   :  { %v1552_v13 = vpop.eup %1551 }
 0x2be   :  { %v817_v11 = vadd.f32 %v1552_v13, %v816_v42  ;;  %v1554_v61 = vpop.eup %1553  ;;  %v3010_v42 = vlaneseq }
 0x2c0   :  { %1000 = vadd.xlane.f32.xlu0 %v1542_v30  ;;  %v1556_v30 = vpop.eup %1555  ;;  %v2650_v13 = vand.u32 127, %v3010_v42 }
 0x2c2   :  { %vm1185_vm1 = vcmp.eq.s32.totalorder %v2650_v13, %v2493_v8  ;;  %vm1072_vm2 = vcmp.eq.s32.totalorder %v2650_v13, %v2497_v43 }
 0x2c4   :  { %1004 = vadd.xlane.f32.xlu0 %v1546_v27  ;;  %v1558_v27 = vpop.eup %1557 }
 0x2c5   :  { %v1560_v37 = vpop.eup %1559 }
 0x2c8   :  { %1008 = vadd.xlane.f32.xlu0 %v1550_v15 }
 0x2ce   :  { %818 = vadd.xlane.f32.xlu1 %v817_v11 }
 0x2d0   :  { %v909_v35 = vpop.xlane.xlu0 %908 }
 0x2d2   :  { %998 = vadd.xlane.f32.xlu1 %v1554_v61 }
 0x2d6   :  { %1002 = vadd.xlane.f32.xlu1 %v1556_v30 }
 0x2d8   :  { %v911_v0 = vpop.xlane.xlu1 %910 }
 0x2d9   :  { %1561 = vlog2.f32 %v911_v0 }
 0x2da   :  { %1006 = vadd.xlane.f32.xlu1 %v1558_v27 }
 0x2db   :  { %v791_v9 = vpop.xlane.xlu0 %790 }
 0x2dc   :  { %1563 = vlog2.f32 %v791_v9 }
 0x2dd   :  { %1565 = vlog2.f32 %v909_v35  ;;  %v2654_v35 = vadd.s32 128, %v2650_v13 }
 0x2de   :  { %1010 = vadd.xlane.f32.xlu1 %v1560_v37  ;;  %1246 = vperm.xlu0 %1479, %v1475_v53  }
 0x2df   :  { %v913_v12 = vpop.xlane.xlu0 %912  ;;  %vm1073_vm3 = vcmp.eq.s32.totalorder %v2654_v35, %v2497_v43 }
 0x2e0   :  { %1567 = vlog2.f32 %v913_v12 }
 0x2e3   :  { %v799_v15 = vpop.xlane.xlu0 %798 }
 0x2e4   :  { %1569 = vlog2.f32 %v799_v15 }
 0x2e5   :  { %v795_v62 = vpop.xlane.xlu1 %794 }
 0x2e6   :  { %v1562_v18 = vpop.eup %1561  ;;  %1571 = vlog2.f32 %v795_v62 }
 0x2e7   :  { %v927_v45 = vmul.f32 0.6931472, %v1562_v18  ;;  %v917_v11 = vpop.xlane.xlu0 %916 }
 0x2e8   :  { %1573 = vlog2.f32 %v917_v11 }
 0x2e9   :  { %v1564_v61 = vpop.eup %1563  ;;  %v915_v49 = vpop.xlane.xlu1 %914  ;;  %v941_v30 = vadd.f32 %v927_v45, %v2519_v20 }
 0x2ea   :  { %v821_v0 = vmul.f32 0.6931472, %v1564_v61  ;;  %1575 = vlog2.f32 %v915_v49  ;;  %v1566_v9 = vpop.eup %1565 }
 0x2eb   :  { %v949_v27 = vsub.f32 %v2345_v38, %v941_v30  ;;  %v2668_v30 = vadd.s32 256, %v2650_v13 }
 0x2ec   :  { %v836_v53 = vadd.f32 %v821_v0, %v2511_v3  ;;  %v807_v12 = vpop.xlane.xlu0 %806  ;;  %v925_v3 = vmul.f32 0.6931472, %v1566_v9  ;;  %v3013_v9 = vld [vmem:[#allocation27_spill] sm:$0xff] }
 0x2ed   :  { %v1568_v37 = vpop.eup %1567  ;;  %v803_v15 = vpop.xlane.xlu1 %802  ;;  %v1193_v62 = vsel %vm1185_vm1, %v949_v27, 0.0  ;;  %1577 = vlog2.f32 %v807_v12  ;;  %v3012_v27 = vld [vmem:[#allocation3_spill] sm:$0xff]  ;;  %vm1186_vm4 = vcmp.eq.s32.totalorder %v2650_v13, %v3013_v9  ;;  %vm1074_vm5 = vcmp.eq.s32.totalorder %v2668_v30, %v2497_v43 }
 0x2ee   :  { %v929_v18 = vmul.f32 0.6931472, %v1568_v37  ;;  %1202 = vadd.xlane.f32.xlu1 %v1193_v62  ;;  %v844_v20 = vsub.f32 %v2323_v23, %v836_v53  ;;  %v845_v42 = vsub.f32 %v2326_v25, %v836_v53  ;;  %1579 = vlog2.f32 %v803_v15  ;;  %v3011_v25 = vld [vmem:[#allocation9_spill] sm:$0xff] }
 0x2ef   :  { %v2672_v37 = vsub.f32 %v3012_v27, %v836_v53 }
 0x2f0   :  { %v942_v38 = vadd.f32 %v929_v18, %v2523_v10  ;;  %v1096_v8 = vsel %vm1072_vm2, %v844_v20, 0.0  ;;  %v1097_v45 = vsel %vm1073_vm3, %v845_v42, 0.0  ;;  %v921_v61 = vpop.xlane.xlu0 %920  ;;  %v3014_v20 = vld [vmem:[#allocation32_spill] sm:$0xff] }
 0x2f1   :  { %v1570_v11 = vpop.eup %1569  ;;  %v919_v49 = vpop.xlane.xlu1 %918  ;;  %1581 = vlog2.f32 %v921_v61  ;;  %v1120_v10 = vadd.f32 %v1097_v45, %v1096_v8  ;;  %v940_v42 = vadd.f32 %v925_v3, %v3014_v20  ;;  %v3015_v61 = vld [vmem:[#allocation6_spill] sm:$0xff]  ;;  %v3016_v45 = vld [vmem:[#allocation7_spill] sm:$0xff] }
 0x2f2   :  { %v825_v23 = vmul.f32 0.6931472, %v1570_v11  ;;  %v950_v0 = vsub.f32 %v3011_v25, %v942_v38  ;;  %1583 = vlog2.f32 %v919_v49  ;;  %v1098_v11 = vsel %vm1074_vm5, %v2672_v37, 0.0  ;;  %v3018_v3 = vld [vmem:[#allocation22_spill] sm:$0xff] }
 0x2f3   :  { %v1572_v12 = vpop.eup %1571  ;;  %v1121_v8 = vadd.f32 %v1120_v10, %v1098_v11  ;;  %vm1078_vm6 = vcmp.eq.s32.totalorder %v2650_v13, %v3018_v3  ;;  %vm1079_vm7 = vcmp.eq.s32.totalorder %v2654_v35, %v3018_v3  ;;  %vm1080_vm10 = vcmp.eq.s32.totalorder %v2668_v30, %v3018_v3 }
 0x2f4   :  { %v838_v15 = vadd.f32 %v825_v23, %v2531_v40  ;;  %v823_v62 = vmul.f32 0.6931472, %v1572_v12  ;;  %v1194_v18 = vsel %vm1186_vm4, %v950_v0, 0.0  ;;  %v3017_v0 = vld [vmem:[#allocation2_spill] sm:$0xff]  ;;  %v3019_v12 = vld [vmem:[#allocation5_spill] sm:$0xff] }
 0x2f5   :  { %v1574_v50 = vpop.eup %1573  ;;  %1204 = vadd.xlane.f32.xlu1 %v1194_v18  ;;  %v948_v27 = vsub.f32 %v3017_v0, %v940_v42  ;;  %v3021_v18 = vld [vmem:[#allocation4_spill] sm:$0xff] }
 0x2f6   :  { %v837_v53 = vadd.f32 %v823_v62, %v2527_v26  ;;  %v933_v38 = vmul.f32 0.6931472, %v1574_v50  ;;  %v850_v49 = vsub.f32 %v3015_v61, %v838_v15  ;;  %v851_v40 = vsub.f32 %v3016_v45, %v838_v15  ;;  %v3020_v62 = vld [vmem:[#allocation33_spill] sm:$0xff]  ;;  %v3022_v61 = vld [vmem:[#allocation26_spill] sm:$0xff]  ;;  %v3023_v42 = vld [vmem:[#allocation28_spill] sm:$0xff] }
 0x2f7   :  { %v1576_v25 = vpop.eup %1575  ;;  %vm1184_vm8 = vcmp.eq.s32.totalorder %v2650_v13, %v3022_v61  ;;  %vm1187_vm9 = vcmp.eq.s32.totalorder %v2650_v13, %v3023_v42 }
 0x2f8   :  { %v931_v23 = vmul.f32 0.6931472, %v1576_v25  ;;  %v1102_v26 = vsel %vm1078_vm6, %v850_v49, 0.0  ;;  %v1103_v50 = vsel %vm1079_vm7, %v851_v40, 0.0  ;;  %v944_v43 = vadd.f32 %v933_v38, %v2555_v1  ;;  %v3024_v25 = vld [vmem:[#allocation10_spill] sm:$0xff] }
 0x2f9   :  { %1122 = vadd.xlane.f32.xlu1 %v1121_v8  ;;  %v847_v9 = vsub.f32 %v3019_v12, %v837_v53  ;;  %v848_v20 = vsub.f32 %v3021_v18, %v837_v53  ;;  %v2698_v45 = vsub.f32 %v3024_v25, %v838_v15  ;;  %v3025_v49 = vld [vmem:[#allocation14_spill] sm:$0xff]  ;;  %v1128_v40 = vadd.f32 %v1103_v50, %v1102_v26  ;;  %v3029_v50 = vld [vmem:[#allocation8_spill] sm:$0xff] }
 0x2fa   :  { %v943_v10 = vadd.f32 %v931_v23, %v3020_v62  ;;  %v1578_v11 = vpop.eup %1577  ;;  %v3026_v23 = vld [vmem:[#allocation21_spill] sm:$0xff]  ;;  %v1192_v0 = vsel %vm1184_vm8, %v948_v27, 0.0  ;;  %v952_v12 = vsub.f32 %v2405_v29, %v944_v43  ;;  %v2718_v43 = vsub.f32 %v3029_v50, %v837_v53  ;;  %v3031_v25 = vld [vmem:[#allocation16_spill] sm:$0xff] }
 0x2fb   :  { %v1580_v1 = vpop.eup %1579  ;;  %v829_v38 = vmul.f32 0.6931472, %v1578_v11  ;;  %vm1075_vm11 = vcmp.eq.s32.totalorder %v2650_v13, %v3026_v23  ;;  %vm1076_vm12 = vcmp.eq.s32.totalorder %v2654_v35, %v3026_v23  ;;  %v1104_v26 = vsel %vm1080_vm10, %v2698_v45, 0.0  ;;  %v3027_v27 = vld [vmem:[#allocation29_spill] sm:$0xff]  ;;  %v3033_v50 = vld [vmem:[#allocation12_spill] sm:$0xff] }
 0x2fc   :  { %v951_v8 = vsub.f32 %v3025_v49, %v943_v10  ;;  %v1099_v62 = vsel %vm1075_vm11, %v847_v9, 0.0  ;;  %v827_v18 = vmul.f32 0.6931472, %v1580_v1  ;;  %v1100_v42 = vsel %vm1076_vm12, %v848_v20, 0.0  ;;  %v3028_v29 = vld [vmem:[#allocation25_spill] sm:$0xff]  ;;  %v3030_v10 = vld [vmem:[#allocation15_spill] sm:$0xff] }
 0x2fd   :  { %v840_v15 = vadd.f32 %v829_v38, %v2553_v31  ;;  %1200 = vadd.xlane.f32.xlu0 %v1192_v0  ;;  %vm1188_vm13 = vcmp.eq.s32.totalorder %v2650_v13, %v3027_v27  ;;  %vm1084_vm14 = vcmp.eq.s32.totalorder %v2650_v13, %v3028_v29  ;;  %v1129_v9 = vadd.f32 %v1128_v40, %v1104_v26 }
 0x2fe   :  { %v1195_v61 = vsel %vm1187_vm9, %v951_v8, 0.0  ;;  %v1582_v11 = vpop.eup %1581  ;;  %v1196_v49 = vsel %vm1188_vm13, %v952_v12, 0.0  ;;  %vm1085_vm15 = vcmp.eq.s32.totalorder %v2654_v35, %v3028_v29  ;;  %v1124_v8 = vadd.f32 %v1100_v42, %v1099_v62 }
 0x2ff   :  { %1206 = vadd.xlane.f32.xlu1 %v1195_v61  ;;  %v1584_v31 = vpop.eup %1583  ;;  %v856_v20 = vsub.f32 %v3030_v10, %v840_v15  ;;  %v857_v1 = vsub.f32 %v3031_v25, %v840_v15  ;;  %v2723_v38 = vsub.f32 %v2393_v5, %v840_v15  ;;  %v839_v0 = vadd.f32 %v827_v18, %v2545_v41 }
 0x300   :  { %v935_v3 = vmul.f32 0.6931472, %v1584_v31  ;;  %v937_v61 = vmul.f32 0.6931472, %v1582_v11  ;;  %vm1086_vm0 = vcmp.eq.s32.totalorder %v2668_v30, %v3028_v29  ;;  %vm1077_vm1 = vcmp.eq.s32.totalorder %v2668_v30, %v3026_v23  ;;  %v3032_v11 = vld [vmem:[#allocation11_spill] sm:$0xff]  ;;  %v3034_v31 = vld [vmem:[#allocation30_spill] sm:$0xff] }
 0x301   :  { %1130 = vadd.xlane.f32.xlu0 %v1129_v9  ;;  %v1108_v53 = vsel %vm1084_vm14, %v856_v20, 0.0  ;;  %v1109_v27 = vsel %vm1085_vm15, %v857_v1, 0.0  ;;  %v1110_v12 = vsel %vm1086_vm0, %v2723_v38, 0.0  ;;  %v1101_v62 = vsel %vm1077_vm1, %v2718_v43, 0.0  ;;  %v3036_v9 = vld [vmem:[#allocation20_spill] sm:$0xff]  ;;  %v3037_v20 = vld [vmem:[#allocation13_spill] sm:$0xff] }
 0x302   :  { %v1136_v40 = vadd.f32 %v1109_v27, %v1108_v53  ;;  %v945_v5 = vadd.f32 %v935_v3, %v2573_v57  ;;  %v1125_v41 = vadd.f32 %v1124_v8, %v1101_v62  ;;  %v946_v42 = vadd.f32 %v937_v61, %v2577_v34  ;;  %v3035_v57 = vld [vmem:[#allocation24_spill] sm:$0xff]  ;;  %v3038_v1 = vld [vmem:[#allocation31_spill] sm:$0xff]  ;;  %v811_v53 = vpop.xlane.xlu1 %810  ;;  %v2754_v27 = vpop.permute.xlu0 %1070 }
 0x303   :  { %1208 = vadd.xlane.f32.xlu1 %v1196_v49  ;;  %v853_v26 = vsub.f32 %v3032_v11, %v839_v0  ;;  %v854_v29 = vsub.f32 %v3033_v50, %v839_v0  ;;  %vm1189_vm2 = vcmp.eq.s32.totalorder %v2650_v13, %v3034_v31  ;;  %vm1081_vm3 = vcmp.eq.s32.totalorder %v2650_v13, %v3035_v57 }
 0x304   :  { %v1137_v15 = vadd.f32 %v1136_v40, %v1110_v12  ;;  %v953_v18 = vsub.f32 %v2414_v33, %v945_v5  ;;  %vm1082_vm4 = vcmp.eq.s32.totalorder %v2654_v35, %v3035_v57  ;;  %v954_v33 = vsub.f32 %v3036_v9, %v946_v42  ;;  %v3039_v42 = vld [vmem:[#allocation17_spill] sm:$0xff] }
 0x305   :  { %v1105_v10 = vsel %vm1081_vm3, %v853_v26, 0.0  ;;  %v1106_v34 = vsel %vm1082_vm4, %v854_v29, 0.0  ;;  %v2747_v25 = vsub.f32 %v3037_v20, %v839_v0  ;;  %vm1190_vm5 = vcmp.eq.s32.totalorder %v2650_v13, %v3038_v1  ;;  %v3040_v26 = vld [vmem:[#allocation18_spill] sm:$0xff] }
 0x306   :  { %1138 = vadd.xlane.f32.xlu0 %v1137_v15  ;;  %v1197_v23 = vsel %vm1189_vm2, %v953_v18, 0.0  ;;  %v1132_v3 = vadd.f32 %v1106_v34, %v1105_v10  ;;  %v1198_v49 = vsel %vm1190_vm5, %v954_v33, 0.0  ;;  %vm1083_vm6 = vcmp.eq.s32.totalorder %v2668_v30, %v3035_v57  ;;  %v2756_v40 = vpop.permute.xlu0 %1225  ;;  %v3041_v10 = vld [vmem:[#allocation19_spill] sm:$0xff] }
 0x307   :  { %1126 = vadd.xlane.f32.xlu1 %v1125_v41  ;;  %v1107_v8 = vsel %vm1083_vm6, %v2747_v25, 0.0  ;;  %1585 = vlog2.f32 %v811_v53  ;;  %vm1087_vm7 = vcmp.eq.s32.totalorder %v2650_v13, %v2583_v6  ;;  %vm1088_vm8 = vcmp.eq.s32.totalorder %v2654_v35, %v2583_v6 }
 0x308   :  { %v1133_v61 = vadd.f32 %v1132_v3, %v1107_v8  ;;  %vm1191_vm9 = vcmp.eq.s32.totalorder %v2650_v13, %v2609_v44  ;;  %vm1089_vm10 = vcmp.eq.s32.totalorder %v2668_v30, %v2583_v6  ;;  %vm1093_vm14 = vcmp.eq.s32.totalorder %v2650_v13, %v2754_v27 }
 0x309   :  { %vm1094_vm15 = vcmp.eq.s32.totalorder %v2654_v35, %v2754_v27  ;;  %vm1095_vm0 = vcmp.eq.s32.totalorder %v2668_v30, %v2754_v27  ;;  %vm1248_vm2 = vcmp.eq.s32.totalorder %v2650_v13, %v2756_v40 }
 0x30a   :  { %v2758_v0 = vpop.permute.xlu0 %1228 }
 0x30b   :  { %1210 = vadd.xlane.f32.xlu1 %v1197_v23  ;;  %vm1249_vm1 = vcmp.eq.s32.totalorder %v2650_v13, %v2758_v0 }
 0x30e   :  { %v2760_v62 = vpop.permute.xlu0 %1231 }
 0x30f   :  { %1212 = vadd.xlane.f32.xlu1 %v1198_v49  ;;  %vm1250_vm4 = vcmp.eq.s32.totalorder %v2650_v13, %v2760_v62 }
 0x312   :  { %v2763_v18 = vpop.permute.xlu0 %1234 }
 0x313   :  { %1134 = vadd.xlane.f32.xlu1 %v1133_v61  ;;  %vm1251_vm3 = vcmp.eq.s32.totalorder %v2650_v13, %v2763_v18 }
 0x314   :  { %v1586_v12 = vpop.eup %1585 }
 0x315   :  { %v831_v15 = vmul.f32 0.6931472, %v1586_v12 }
 0x316   :  { %v2771_v57 = vpop.permute.xlu0 %1237 }
 0x317   :  { %v841_v41 = vadd.f32 %v831_v15, %v2567_v63  ;;  %vm1252_vm6 = vcmp.eq.s32.totalorder %v2650_v13, %v2771_v57 }
 0x319   :  { %v859_v11 = vsub.f32 %v3039_v42, %v841_v41  ;;  %v860_v50 = vsub.f32 %v3040_v26, %v841_v41  ;;  %v2776_v34 = vsub.f32 %v3041_v10, %v841_v41 }
 0x31a   :  { %v2780_v3 = vpop.permute.xlu0 %1240 }
 0x31b   :  { %v1111_v9 = vsel %vm1087_vm7, %v859_v11, 0.0  ;;  %v1112_v63 = vsel %vm1088_vm8, %v860_v50, 0.0  ;;  %vm1253_vm5 = vcmp.eq.s32.totalorder %v2650_v13, %v2780_v3 }
 0x31c   :  { %v1140_v20 = vadd.f32 %v1112_v63, %v1111_v9 }
 0x31e   :  { %v2785_v8 = vpop.permute.xlu0 %1243 }
 0x31f   :  { %vm1254_vm8 = vcmp.eq.s32.totalorder %v2650_v13, %v2785_v8 }
 0x322   :  { %v923_v5 = vpop.xlane.xlu1 %922 }
 0x323   :  { %1587 = vlog2.f32 %v923_v5 }
 0x326   :  { %v1068_v44 = vpop.permute.xlu1 %1067 }
 0x327   :  { %vm1090_vm11 = vcmp.eq.s32.totalorder %v2650_v13, %v1068_v44  ;;  %vm1091_vm12 = vcmp.eq.s32.totalorder %v2654_v35, %v1068_v44  ;;  %vm1092_vm13 = vcmp.eq.s32.totalorder %v2668_v30, %v1068_v44 }
 0x330   :  { %v1588_v29 = vpop.eup %1587 }
 0x331   :  { %v939_v31 = vmul.f32 0.6931472, %v1588_v29 }
 0x333   :  { %v947_v23 = vadd.f32 %v939_v31, %v2590_v52  ;;  %v1113_v52 = vsel %vm1089_vm10, %v2776_v34, 0.0 }
 0x334   :  { %v1141_v49 = vadd.f32 %v1140_v20, %v1113_v52 }
 0x335   :  { %v955_v33 = vsub.f32 %v2455_v46, %v947_v23 }
 0x337   :  { %v1199_v1 = vsel %vm1191_vm9, %v955_v33, 0.0 }
 0x338   :  { %1214 = vadd.xlane.f32.xlu1 %v1199_v1 }
 0x33c   :  { %1142 = vadd.xlane.f32.xlu1 %v1141_v49 }
 0x341   :  { %v815_v46 = vpop.xlane.xlu0 %814 }
 0x342   :  { %1589 = vlog2.f32 %v815_v46 }
 0x345   :  { %v997_v61 = vpop.xlane.xlu0 %996 }
 0x346   :  { %1591 = vlog2.f32 %v997_v61 }
 0x349   :  { %v1001_v15 = vpop.xlane.xlu0 %1000 }
 0x34f   :  { %v1590_v53 = vpop.eup %1589 }
 0x350   :  { %v833_v5 = vmul.f32 0.6931472, %v1590_v53 }
 0x352   :  { %v842_v12 = vadd.f32 %v833_v5, %v2587_v39 }
 0x353   :  { %v1592_v63 = vpop.eup %1591 }
 0x354   :  { %v862_v41 = vsub.f32 %v2430_v19, %v842_v12  ;;  %v863_v42 = vsub.f32 %v2433_v22, %v842_v12  ;;  %v2791_v6 = vsub.f32 %v2436_v36, %v842_v12  ;;  %v1005_v19 = vpop.xlane.xlu0 %1004  ;;  %v1013_v20 = vmul.f32 0.6931472, %v1592_v63 }
 0x356   :  { %v1114_v26 = vsel %vm1090_vm11, %v862_v41, 0.0  ;;  %v1115_v50 = vsel %vm1091_vm12, %v863_v42, 0.0  ;;  %v1116_v29 = vsel %vm1092_vm13, %v2791_v6, 0.0 }
 0x357   :  { %v819_v11 = vpop.xlane.xlu1 %818  ;;  %v1144_v39 = vadd.f32 %v1115_v50, %v1114_v26 }
 0x358   :  { %1593 = vlog2.f32 %v819_v11  ;;  %v1009_v23 = vpop.xlane.xlu0 %1008 }
 0x359   :  { %v1145_v31 = vadd.f32 %v1144_v39, %v1116_v29  ;;  %1595 = vlog2.f32 %v1001_v15  ;;  %v1028_v15 = vadd.f32 %v1013_v20, %v2603_v60 }
 0x35b   :  { %v999_v22 = vpop.xlane.xlu1 %998  ;;  %1146 = vadd.xlane.f32.xlu0 %v1145_v31  ;;  %v1036_v60 = vsub.f32 %v2459_v2, %v1028_v15 }
 0x35c   :  { %1597 = vlog2.f32 %v999_v22 }
 0x35d   :  { %1599 = vlog2.f32 %v1005_v19  ;;  %v1256_v2 = vsel %vm1248_vm2, %v1036_v60, 0.0 }
 0x35f   :  { %v1003_v36 = vpop.xlane.xlu1 %1002 }
 0x360   :  { %1601 = vlog2.f32 %v1003_v36 }
 0x361   :  { %1603 = vlog2.f32 %v1009_v23 }
 0x363   :  { %v1007_v9 = vpop.xlane.xlu1 %1006 }
 0x364   :  { %1605 = vlog2.f32 %v1007_v9 }
 0x365   :  { %v1594_v33 = vpop.eup %1593 }
 0x366   :  { %v835_v10 = vmul.f32 0.6931472, %v1594_v33  ;;  %v1596_v52 = vpop.eup %1595 }
 0x367   :  { %v1011_v1 = vpop.xlane.xlu1 %1010  ;;  %v1017_v12 = vmul.f32 0.6931472, %v1596_v52 }
 0x368   :  { %v843_v49 = vadd.f32 %v835_v10, %v2616_v47  ;;  %1607 = vlog2.f32 %v1011_v1  ;;  %v3042_v10 = vld [vmem:[#allocation23_spill] sm:$0xff] }
 0x369   :  { %v1598_v46 = vpop.eup %1597  ;;  %v1030_v39 = vadd.f32 %v1017_v12, %v2607_v24 }
 0x36a   :  { %v1015_v61 = vmul.f32 0.6931472, %v1598_v46  ;;  %v865_v53 = vsub.f32 %v2441_v54, %v843_v49  ;;  %v866_v5 = vsub.f32 %v2444_v56, %v843_v49  ;;  %v2801_v44 = vsub.f32 %v2449_v4, %v843_v49  ;;  %v1600_v47 = vpop.eup %1599 }
 0x36b   :  { %v1038_v24 = vsub.f32 %v2467_v32, %v1030_v39  ;;  %v1247_v32 = vpop.permute.xlu0 %1246 }
 0x36c   :  { %v1117_v41 = vsel %vm1093_vm14, %v865_v53, 0.0  ;;  %v1118_v42 = vsel %vm1094_vm15, %v866_v5, 0.0  ;;  %v1029_v11 = vadd.f32 %v1015_v61, %v2628_v14  ;;  %v1119_v26 = vsel %vm1095_vm0, %v2801_v44, 0.0 }
 0x36d   :  { %v1602_v54 = vpop.eup %1601  ;;  %v1148_v56 = vadd.f32 %v1118_v42, %v1117_v41  ;;  %v1021_v14 = vmul.f32 0.6931472, %v1600_v47  ;;  %v1258_v18 = vsel %vm1250_vm4, %v1038_v24, 0.0  ;;  %vm1255_vm7 = vcmp.eq.s32.totalorder %v2650_v13, %v1247_v32 }
 0x36e   :  { %v1019_v4 = vmul.f32 0.6931472, %v1602_v54  ;;  %v1037_v50 = vsub.f32 %v2461_v48, %v1029_v11  ;;  %v1604_v29 = vpop.eup %1603 }
 0x36f   :  { %v1149_v35 = vadd.f32 %v1148_v56, %v1119_v26  ;;  %v1025_v0 = vmul.f32 0.6931472, %v1604_v29 }
 0x370   :  { %v1257_v19 = vsel %vm1249_vm1, %v1037_v50, 0.0  ;;  %v1031_v31 = vadd.f32 %v1019_v4, %v2634_v59  ;;  %v1032_v59 = vadd.f32 %v1021_v14, %v2613_v21  ;;  %v1609_v14 = vld [vmem:[%s2948_s1] sm:$0xff] }
 0x371   :  { %v1606_v30 = vpop.eup %1605  ;;  %1150 = vadd.xlane.f32.xlu1 %v1149_v35  ;;  %1266 = vadd.xlane.f32.xlu0 %v1257_v19  ;;  %v1034_v33 = vadd.f32 %v1025_v0, %v2626_v17  ;;  %vm1288_vm9 = vcmp.ge.s32.totalorder %v1609_v14, 256  ;;  %vm1296_vm10 = vcmp.lt.s32.totalorder %v1609_v14, 384  ;;  %vm1280_vm14 = vcmp.lt.s32.totalorder %v1609_v14, 256 }
 0x372   :  { %v1023_v48 = vmul.f32 0.6931472, %v1606_v30  ;;  %v1039_v27 = vsub.f32 %v2469_v7, %v1031_v31  ;;  %vm1304_vm11 = vmand %vm1288_vm9, %vm1296_vm10  ;;  %v1610_v30 = vld [vmem:[%s2948_s1 + $0x18] sm:$0xff] }
 0x373   :  { %v1042_v20 = vsub.f32 %v3042_v10, %v1034_v33  ;;  %vm1291_vm12 = vcmp.ge.s32.totalorder %v1610_v30, 256  ;;  %vm1299_vm13 = vcmp.lt.s32.totalorder %v1610_v30, 384 }
 0x374   :  { %v1259_v22 = vsel %vm1251_vm3, %v1039_v27, 0.0  ;;  %v1033_v36 = vadd.f32 %v1023_v48, %v2638_v16  ;;  %v1040_v16 = vsub.f32 %v2475_v51, %v1032_v59  ;;  %v1611_v27 = vld [vmem:[%s2948_s1 + $0x8] sm:$0xff]  ;;  %vm2873_vm1 = vmand %vm1291_vm12, %vm1299_vm13 }
 0x375   :  { %v1608_v23 = vpop.eup %1607  ;;  %1264 = vadd.xlane.f32.xlu1 %v1256_v2  ;;  %1270 = vadd.xlane.f32.xlu0 %v1259_v22  ;;  %v1262_v17 = vsel %vm1254_vm8, %v1042_v20, 0.0  ;;  %vm1289_vm15 = vcmp.ge.s32.totalorder %v1611_v27, 256  ;;  %vm1297_vm0 = vcmp.lt.s32.totalorder %v1611_v27, 384  ;;  %vm1281_vm2 = vcmp.lt.s32.totalorder %v1611_v27, 256 }
 0x376   :  { %v1027_v40 = vmul.f32 0.6931472, %v1608_v23  ;;  %v1041_v7 = vsub.f32 %v2477_v55, %v1033_v36  ;;  %v1260_v55 = vsel %vm1252_vm6, %v1040_v16, 0.0  ;;  %vm2877_vm3 = vmand %vm1289_vm15, %vm1297_vm0  ;;  %v1613_v23 = vld [vmem:[%s2948_s1 + $0x10] sm:$0xff]  ;;  %vm1283_vm8 = vcmp.lt.s32.totalorder %v1610_v30, 256 }
 0x377   :  { %v1203_v9 = vpop.xlane.xlu1 %1202  ;;  %vm1290_vm6 = vcmp.ge.s32.totalorder %v1613_v23, 256  ;;  %vm1282_vm10 = vcmp.lt.s32.totalorder %v1613_v23, 256 }
 0x378   :  { %v1261_v63 = vsel %vm1253_vm5, %v1041_v7, 0.0  ;;  %v1035_v21 = vadd.f32 %v1027_v40, %v2644_v28  ;;  %v1313_v57 = vadd.f32 %v1203_v9, %v2718_v43 }
 0x379   :  { %1268 = vadd.xlane.f32.xlu1 %v1258_v18  ;;  %1274 = vadd.xlane.f32.xlu0 %v1261_v63 }
 0x37a   :  { %v1043_v62 = vsub.f32 %v2483_v58, %v1035_v21 }
 0x37c   :  { %v1263_v3 = vsel %vm1255_vm7, %v1043_v62, 0.0  ;;  %vm1298_vm7 = vcmp.lt.s32.totalorder %v1613_v23, 384 }
 0x37d   :  { %1272 = vadd.xlane.f32.xlu1 %v1260_v55  ;;  %1278 = vadd.xlane.f32.xlu0 %v1263_v3 }
 0x37e   :  { %v1205_v51 = vpop.xlane.xlu1 %1204 }
 0x37f   :  { %v1314_v61 = vadd.f32 %v1205_v51, %v2698_v45 }
 0x381   :  { %1276 = vadd.xlane.f32.xlu1 %v1262_v17 }
 0x382   :  { %v1123_v28 = vpop.xlane.xlu1 %1122 }
 0x386   :  { %v1201_v52 = vpop.xlane.xlu0 %1200 }
 0x387   :  { %v1312_v46 = vadd.f32 %v1201_v52, %v2672_v37 }
 0x388   :  { %v1207_v1 = vpop.xlane.xlu1 %1206 }
 0x389   :  { %v1315_v13 = vadd.f32 %v1207_v1, %v2747_v25 }
 0x38a   :  { %v2851_v11 = vpop.xlane.xlu0 %1130 }
 0x38c   :  { %v1209_v58 = vpop.xlane.xlu1 %1208 }
 0x38d   :  { %v1316_v8 = vadd.f32 %v1209_v58, %v2723_v38 }
 0x38f   :  { %v2853_v54 = vpop.xlane.xlu0 %1138 }
 0x390   :  { %v2842_v49 = vpop.xlane.xlu1 %1126 }
 0x392   :  { %1338 = vrot.lane.b32.xlu1 %v1313_v57, %s1619_s15 }
 0x393   :  { %1336 = vrot.lane.b32.xlu0 %v1312_v46, %s1619_s15 }
 0x394   :  { %v1211_v53 = vpop.xlane.xlu1 %1210 }
 0x395   :  { %v1317_v5 = vadd.f32 %v1211_v53, %v2776_v34 }
 0x396   :  { %1340 = vrot.lane.b32.xlu1 %v1314_v61, %s1619_s15 }
 0x397   :  { %1342 = vrot.lane.b32.xlu0 %v1315_v13, %s1619_s15 }
 0x398   :  { %v1213_v12 = vpop.xlane.xlu1 %1212 }
 0x399   :  { %v1318_v15 = vadd.f32 %v1213_v12, %v2791_v6 }
 0x39a   :  { %1344 = vrot.lane.b32.xlu1 %v1316_v8, %s1619_s15 }
 0x39b   :  { %1346 = vrot.lane.b32.xlu0 %v1317_v5, %s1619_s15 }
 0x39c   :  { %v1135_v47 = vpop.xlane.xlu1 %1134 }
 0x39e   :  { %1348 = vrot.lane.b32.xlu1 %v1318_v15, %s1619_s15  ;;  %v1616_v15 = vld [vmem:[%s2948_s1 + $0x38] sm:$0xff] }
 0x3c1   :  { %v1215_v41 = vpop.xlane.xlu1 %1214 }
 0x3c2   :  { %v1319_v42 = vadd.f32 %v1215_v41, %v2801_v44 }
 0x3c4   :  { %1350 = vrot.lane.b32.xlu0 %v1319_v42, %s1619_s15 }
 0x3c5   :  { %v2855_v56 = vpop.xlane.xlu1 %1142 }
 0x3e4   :  { %v2857_v4 = vpop.xlane.xlu0 %1146 }
 0x3fa   :  { %v1267_v26 = vpop.xlane.xlu0 %1266  ;;  %v2859_v50 = vpop.xlane.xlu1 %1150 }
 0x3fb   :  { %v1321_v40 = vadd.f32 %v1267_v26, %v2718_v43 }
 0x3fe   :  { %v1271_v35 = vpop.xlane.xlu0 %1270  ;;  %v1265_v60 = vpop.xlane.xlu1 %1264 }
 0x3ff   :  { %v1320_v48 = vadd.f32 %v1265_v60, %v2672_v37  ;;  %v1612_v37 = vld [vmem:[%s2948_s1 + $0x28] sm:$0xff]  ;;  %v1323_v7 = vadd.f32 %v1271_v35, %v2747_v25  ;;  %v1614_v25 = vld [vmem:[%s2948_s1 + $0x20] sm:$0xff] }
 0x400   :  { %vm1293_vm4 = vcmp.ge.s32.totalorder %v1612_v37, 256  ;;  %vm1301_vm5 = vcmp.lt.s32.totalorder %v1612_v37, 384  ;;  %vm1292_vm12 = vcmp.ge.s32.totalorder %v1614_v25, 256  ;;  %vm1300_vm13 = vcmp.lt.s32.totalorder %v1614_v25, 384 }
 0x401   :  { %vm2893_vm9 = vmand %vm1293_vm4, %vm1301_vm5  ;;  %vm1284_vm15 = vcmp.lt.s32.totalorder %v1614_v25, 256  ;;  %vm1295_vm5 = vcmp.ge.s32.totalorder %v1616_v15, 256 }
 0x402   :  { %v1275_v39 = vpop.xlane.xlu0 %1274  ;;  %v1269_v29 = vpop.xlane.xlu1 %1268  ;;  %vm1308_vm0 = vmand %vm1292_vm12, %vm1300_vm13 }
 0x403   :  { %v1325_v33 = vadd.f32 %v1275_v39, %v2776_v34  ;;  %v1322_v62 = vadd.f32 %v1269_v29, %v2698_v45  ;;  %v1615_v34 = vld [vmem:[%s2948_s1 + $0x30] sm:$0xff] }
 0x404   :  { %vm1286_vm4 = vcmp.lt.s32.totalorder %v1615_v34, 256 }
 0x406   :  { %v2864_v19 = vpop.xlane.xlu0 %1278  ;;  %v1273_v31 = vpop.xlane.xlu1 %1272 }
 0x407   :  { %v1324_v45 = vadd.f32 %v1273_v31, %v2723_v38 }
 0x40a   :  { %v1337_v2 = vpop.permute.xlu0 %1336  ;;  %v1277_v24 = vpop.xlane.xlu1 %1276 }
 0x40b   :  { %v1360_v0 = vsel %vm1304_vm11, %v1337_v2, %v1320_v48  ;;  %vm1306_vm11 = vmand %vm1290_vm6, %vm1298_vm7  ;;  %v1326_v61 = vadd.f32 %v1277_v24, %v2791_v6  ;;  %vm1303_vm6 = vcmp.lt.s32.totalorder %v1616_v15, 384  ;;  %v1327_v6 = vadd.f32 %v2864_v19, %v2801_v44 }
 0x40c   :  { %v1368_v36 = vsel %vm1280_vm14, %v1123_v28, %v1360_v0  ;;  %vm1285_vm14 = vcmp.lt.s32.totalorder %v1612_v37, 256  ;;  %vm1311_vm7 = vmand %vm1295_vm5, %vm1303_vm6 }
 0x40d   :  { %v1376_v18 = vsub.f32 0.0, %v1368_v36 }
 0x40e   :  { %v1343_v32 = vpop.permute.xlu0 %1342  ;;  %v1339_v9 = vpop.permute.xlu1 %1338 }
 0x40f   :  { %v1363_v63 = vsel %vm2873_vm1, %v1343_v32, %v1323_v7  ;;  %v1361_v16 = vsel %vm2877_vm3, %v1339_v9, %v1321_v40  ;;  %1386 = vperm.xlu1 %1480, %v1376_v18   ;;  %vm1294_vm1 = vcmp.ge.s32.totalorder %v1615_v34, 256 }
 0x410   :  { %v1369_v43 = vsel %vm1281_vm2, %v2842_v49, %v1361_v16  ;;  %v1371_v3 = vsel %vm1283_vm8, %v1135_v47, %v1363_v63  ;;  %vm1302_vm2 = vcmp.lt.s32.totalorder %v1615_v34, 384  ;;  %vm1287_vm8 = vcmp.lt.s32.totalorder %v1616_v15, 256 }
 0x411   :  { %v1377_v55 = vsub.f32 0.0, %v1369_v43  ;;  %v1379_v1 = vsub.f32 0.0, %v1371_v3  ;;  %vm1310_vm3 = vmand %vm1294_vm1, %vm1302_vm2 }
 0x412   :  { %v1347_v10 = vpop.permute.xlu0 %1346  ;;  %v1341_v20 = vpop.permute.xlu1 %1340 }
 0x413   :  { %v1365_v51 = vsel %vm2893_vm9, %v1347_v10, %v1325_v33  ;;  %v1362_v17 = vsel %vm1306_vm11, %v1341_v20, %v1322_v62  ;;  %1391 = vperm.xlu0 %1479, %v1377_v55  }
 0x414   :  { %v1370_v28 = vsel %vm1282_vm10, %v2851_v11, %v1362_v17  ;;  %v1373_v52 = vsel %vm1285_vm14, %v2855_v56, %v1365_v51 }
 0x415   :  { %v1378_v58 = vsub.f32 0.0, %v1370_v28  ;;  %v1381_v53 = vsub.f32 0.0, %v1373_v52 }
 0x416   :  { %v1345_v57 = vpop.permute.xlu1 %1344 }
 0x417   :  { %v1364_v49 = vsel %vm1308_vm0, %v1345_v57, %v1324_v45  ;;  %1401 = vperm.xlu0 %1479, %v1379_v1   ;;  %1396 = vperm.xlu1 %1480, %v1378_v58  }
 0x418   :  { %v1372_v46 = vsel %vm1284_vm15, %v2853_v54, %v1364_v49 }
 0x419   :  { %v1380_v13 = vsub.f32 0.0, %v1372_v46 }
 0x41a   :  { %v1349_v8 = vpop.permute.xlu1 %1348 }
 0x41b   :  { %v1366_v5 = vsel %vm1310_vm3, %v1349_v8, %v1326_v61  ;;  %1411 = vperm.xlu0 %1479, %v1381_v53   ;;  %1406 = vperm.xlu1 %1480, %v1380_v13  }
 0x41c   :  { %v1374_v38 = vsel %vm1286_vm4, %v2857_v4, %v1366_v5 }
 0x41d   :  { %v1382_v12 = vsub.f32 0.0, %v1374_v38 }
 0x41f   :  { %1416 = vperm.xlu1 %1480, %v1382_v12  }
 0x436   :  { %v1351_v47 = vpop.permute.xlu0 %1350 }
 0x437   :  { %v1367_v41 = vsel %vm1311_vm7, %v1351_v47, %v1327_v6 }
 0x438   :  { %v1375_v42 = vsel %vm1287_vm8, %v2859_v50, %v1367_v41 }
 0x439   :  { %v1383_v11 = vsub.f32 0.0, %v1375_v42 }
 0x43b   :  { %1421 = vperm.xlu0 %1479, %v1383_v11  }
 0x48a   :  { %v1387_v54 = vpop.permute.xlu1 %1386 }
 0x48b   :  { %1424 = vst [vmem:[%s2950_s5] sm:$0xff] %v1387_v54 }
 0x48e   :  { %v1392_v56 = vpop.permute.xlu0 %1391 }
 0x48f   :  { %1425 = vst [vmem:[%s2950_s5 + $0x8] sm:$0xff] %v1392_v56 }
 0x492   :  { %v1402_v4 = vpop.permute.xlu0 %1401  ;;  %v1397_v26 = vpop.permute.xlu1 %1396 }
 0x493   :  { %1427 = vst [vmem:[%s2950_s5 + $0x18] sm:$0xff] %v1402_v4  ;;  %1426 = vst [vmem:[%s2950_s5 + $0x10] sm:$0xff] %v1397_v26 }
 0x496   :  { %v1412_v44 = vpop.permute.xlu0 %1411  ;;  %v1407_v50 = vpop.permute.xlu1 %1406 }
 0x497   :  { %1429 = vst [vmem:[%s2950_s5 + $0x28] sm:$0xff] %v1412_v44  ;;  %1428 = vst [vmem:[%s2950_s5 + $0x20] sm:$0xff] %v1407_v50 }
 0x49a   :  { %v1417_v35 = vpop.permute.xlu1 %1416 }
 0x49b   :  { %1430 = vst [vmem:[%s2950_s5 + $0x30] sm:$0xff] %v1417_v35 }
 0x4b6   :  { %v1422_v60 = vpop.permute.xlu0 %1421 }
 0x4b7   :  { %1431 = vst [vmem:[%s2950_s5 + $0x38] sm:$0xff] %v1422_v60 }

</bundles_post_ra>
